<compile_context>
chip_gen: v6e
topology: v6e:2x2x1
jax: 0.10.0
libtpu: 0.0.40
codegen_flags: <defaults>
</compile_context>

<pallas_src>
import jax
import jax.numpy as jnp
from jax.experimental import pallas as pl
from jax.experimental.pallas import tpu as pltpu

TEXT_DIM = 64
VISION_DIM = 48
AUDIO_DIM = 32
IN_DIM = TEXT_DIM + VISION_DIM + AUDIO_DIM      # 144
HIDDEN_DIM = 64
NUM_HEADS = 8
HEAD_DIM = HIDDEN_DIM // NUM_HEADS
LN_EPS = 1e-5


def _round_up(x, m):
    return ((x + m - 1) // m) * m


def _cdiv(a, b):
    return (a + b - 1) // b


def attention_fusion_kernel(
    xin_ref,
    w_kc_ref, b_kc_ref, w_vc_ref, b_vc_ref,
    w_qc_ref, b_qc_ref,
    seg3_ref, bc24_ref, pb3_ref,
    w_fold_ref, b1f_ref, w2_ref, b2_ref,
    gamma_ref, beta_ref,
    out_ref,
):
    f32 = jnp.float32
    bf16 = jnp.bfloat16

    def bdot(x, w):
        # single-pass bf16 MXU matmul with f32 accumulation (w already bf16)
        return jnp.dot(x.astype(bf16), w, preferred_element_type=f32)

    def hp01_dot(x_f32, w01_bf16):
        # 2-pass (hi/lo bf16) matmul against an exact 0/1 matrix: the f32
        # operand is split so products are not truncated before the reduction.
        hi = x_f32.astype(bf16)
        lo = (x_f32 - hi.astype(f32)).astype(bf16)
        return (jnp.dot(hi, w01_bf16, preferred_element_type=f32)
                + jnp.dot(lo, w01_bf16, preferred_element_type=f32))

    xin = xin_ref[...].astype(bf16)                        # [TB, 144]

    # K / V for all 3 modality tokens (modality projection folded into the weight)
    k3 = bdot(xin, w_kc_ref[...]) + b_kc_ref[...]          # [TB, 192] f32
    v3 = bdot(xin, w_vc_ref[...]) + b_vc_ref[...]          # [TB, 192] f32

    seg3 = seg3_ref[...]                                   # [192, 24] 0/1
    bc24 = bc24_ref[...]                                   # [24, 24]  0/1
    pb3 = pb3_ref[...]                                     # [24, 192] 0/1

    # Accumulate the first fusion Linear directly; out_proj + fold-over-keys +
    # the w1 row-block for query i are all pre-folded into w_fold[i].
    pre = b1f_ref[...]                                     # [1, 128] (broadcasts up)

    for i in range(3):
        # q_i replicated across the 3 key positions, 1/sqrt(head_dim) folded in.
        q_rep = bdot(xin, w_qc_ref[i]) + b_qc_ref[i]       # [TB, 192]
        # per-head scores of query i vs all 3 keys, all heads at once
        s = hp01_dot(q_rep * k3, seg3)                     # [TB, 24] = (key, head)
        # Softmax over the 3 keys per head.  Subtracting the per-row max over
        # all 24 lanes is constant within each head group, so the result is
        # exactly the per-group softmax (and numerically safe for any
        # realistic score spread across heads).
        m = jnp.max(s, axis=-1, keepdims=True)
        e = jnp.exp(s - m)                                 # [TB, 24], lane-batched
        denom = bdot(e, bc24)                              # sum over keys, broadcast back
        p = e * pl.reciprocal(denom, approx=True)          # [TB, 24]
        ctx = bdot(p, pb3) * v3                            # [TB, 192]
        pre = pre + bdot(ctx, w_fold_ref[i])               # [TB, 128]

    h1 = jnp.maximum(pre, 0.0)
    # TODO(synk): nn.Dropout(0.1) is identity in eval mode; training-mode dropout not implemented.
    fused = jnp.tanh(bdot(h1, w2_ref[...]) + b2_ref[...])  # [TB, 64]

    # LayerNorm over the hidden dim
    mean = jnp.mean(fused, axis=-1, keepdims=True)
    c = fused - mean
    var = jnp.mean(c * c, axis=-1, keepdims=True)
    out_ref[...] = c * jax.lax.rsqrt(var + LN_EPS) * gamma_ref[...] + beta_ref[...]


_WEIGHT_ORDER = (
    "w_kc", "b_kc", "w_vc", "b_vc", "w_qc", "b_qc",
    "seg3", "bc24", "pb3", "w_fold", "b1f", "w2", "b2", "gamma", "beta",
)


def attention_fusion(prepared, text, vision, audio, *, tile_b=1024):
    """Pallas forward pass. `prepared` comes from prepare_params()."""
    B = text.shape[0]
    # One lane-dense input stream instead of 3 lane-sparse ones.
    xin = jnp.concatenate([text, vision, audio], axis=1)          # [B, 144]

    # Batch tile: multiple of 8, default 1024; clamp so the batch grid always
    # has >= 2 steps (lets v7x's two TensorCores split the batch; neutral on
    # v5e/v6e).  v6e/v7x users may pass tile_b=2048.
    tb = min(_round_up(tile_b, 8), _round_up(_cdiv(max(B, 1), 2), 8))
    tb = max(tb, 8)
    n_steps = max(2, _cdiv(B, tb))
    Bp = n_steps * tb
    if Bp != B:
        xin = jnp.pad(xin, ((0, Bp - B), (0, 0)))

    weights = [prepared[k] for k in _WEIGHT_ORDER]

    in_specs = (
        [pl.BlockSpec((tb, IN_DIM), lambda i: (i, 0))]
        # params: full-array blocks with constant index_map -> VMEM-resident
        # across grid steps while the batch tiles stream through.
        + [pl.BlockSpec(w.shape, lambda i, _n=w.ndim: (0,) * _n) for w in weights]
    )

    out = pl.pallas_call(
        attention_fusion_kernel,
        grid=(n_steps,),
        in_specs=in_specs,
        out_specs=pl.BlockSpec((tb, HIDDEN_DIM), lambda i: (i, 0)),
        out_shape=jax.ShapeDtypeStruct((Bp, HIDDEN_DIM), jnp.float32),
        compiler_params=pltpu.CompilerParams(
            dimension_semantics=("parallel",),
            # ~2x the live footprint (double-buffered [tb,144]/[tb,64] I/O,
            # a handful of [tb,192]/[tb,128] f32 temporaries, <0.5 MiB of
            # resident weights); safe on v5e/v6e (128 MiB) and v7x (64 MiB).
            vmem_limit_bytes=32 * 1024 * 1024,
        ),
    )(xin, *weights)
    return out[:B]


def prepare_params(p):
    """Fold / fuse the module parameters into the kernel-friendly layout."""
    f32 = jnp.float32
    bf16 = jnp.bfloat16
    H, nh, hd = HIDDEN_DIM, NUM_HEADS, HEAD_DIM
    with jax.default_matmul_precision("float32"):
        eye_h = jnp.eye(H, dtype=f32)
        # "input projection" block weight [144, 192]: modality i -> columns i*H..
        w_in = jnp.zeros((IN_DIM, 3 * H), f32)
        w_in = w_in.at[0:TEXT_DIM, 0:H].set(p["wt"])
        w_in = w_in.at[TEXT_DIM:TEXT_DIM + VISION_DIM, H:2 * H].set(p["wv"])
        w_in = w_in.at[TEXT_DIM + VISION_DIM:IN_DIM, 2 * H:3 * H].set(p["wa"])
        b_in = jnp.concatenate([p["bt"], p["bv"], p["ba"]], axis=1)        # [1, 3H]

        # K / V of all 3 tokens with the modality projection folded in.
        wk3 = jnp.kron(jnp.eye(3, dtype=f32), p["wk"])                     # [3H, 3H]
        wv3 = jnp.kron(jnp.eye(3, dtype=f32), p["wvv"])
        w_kc = w_in @ wk3
        b_kc = b_in @ wk3 + jnp.tile(p["bk"], (1, 3))
        w_vc = w_in @ wv3
        b_vc = b_in @ wv3 + jnp.tile(p["bvv"], (1, 3))

        # Per-query weight: modality proj ∘ scaled Wq, replicated across the
        # 3 key positions (so the kernel never lane-concatenates q).
        scale = 1.0 / (hd ** 0.5)
        wq_s = p["wq"] * scale
        bq_s = p["bq"] * scale
        rep = jnp.tile(eye_h, (1, 3))                                      # [H, 3H]
        w_qc, b_qc = [], []
        for i in range(3):
            w_qc.append(w_in[:, i * H:(i + 1) * H] @ wq_s @ rep)           # [144, 3H]
            b_qc.append((b_in[:, i * H:(i + 1) * H] @ wq_s + bq_s) @ rep)  # [1, 3H]
        w_qc = jnp.stack(w_qc)                                             # [3, 144, 3H]
        b_qc = jnp.stack(b_qc)                                             # [3, 1, 3H]

        # Head segment-sum [3H, 3*nh]: column (key j, head h) sums lanes of (j, h).
        col = jnp.arange(3 * H)
        key_head = (col // H) * nh + (col % H) // hd                       # [3H]
        seg3 = (key_head[:, None] == jnp.arange(3 * nh)[None, :]).astype(f32)
        # Softmax denominator: sum over keys then broadcast back, [24, 24].
        r = jnp.arange(3 * nh)
        bc24 = ((r % nh)[:, None] == (r % nh)[None, :]).astype(f32)
        # Probability broadcast back to hidden layout [24, 3H].
        pb3 = seg3.T

        # out_proj + sum-over-keys fold + first fusion Linear, per query position.
        fold = jnp.tile(eye_h, (3, 1))                                     # [3H, H]
        w_fold = jnp.stack(
            [fold @ p["wo"] @ p["w1"][i * H:(i + 1) * H] for i in range(3)])   # [3, 3H, 2H]
        b1f = p["b1"] + p["bo"] @ (p["w1"][0:H] + p["w1"][H:2 * H] + p["w1"][2 * H:3 * H])

    return {
        "w_kc": w_kc.astype(bf16), "b_kc": b_kc,
        "w_vc": w_vc.astype(bf16), "b_vc": b_vc,
        "w_qc": w_qc.astype(bf16), "b_qc": b_qc,
        "seg3": seg3.astype(bf16),        # 0/1 -> exact in bf16
        "bc24": bc24.astype(bf16),
        "pb3": pb3.astype(bf16),
        "w_fold": w_fold.astype(bf16), "b1f": b1f,
        "w2": p["w2"].astype(bf16), "b2": p["b2"],
        "gamma": p["gamma"], "beta": p["beta"],
    }


def init_params(key):
    """PyTorch-module-shaped parameters (all f32)."""
    ks = jax.random.split(key, 20)

    def w(k, shape, scale=0.05):
        return (scale * jax.random.normal(k, shape)).astype(jnp.float32)

    return {
        # modality projections
        "wt": w(ks[0], (TEXT_DIM, HIDDEN_DIM)),   "bt": w(ks[1], (1, HIDDEN_DIM)),
        "wv": w(ks[2], (VISION_DIM, HIDDEN_DIM)), "bv": w(ks[3], (1, HIDDEN_DIM)),
        "wa": w(ks[4], (AUDIO_DIM, HIDDEN_DIM)),  "ba": w(ks[5], (1, HIDDEN_DIM)),
        # MultiheadAttention in_proj (split q/k/v) and out_proj
        "wq": w(ks[6], (HIDDEN_DIM, HIDDEN_DIM)),   "bq": w(ks[7], (1, HIDDEN_DIM)),
        "wk": w(ks[8], (HIDDEN_DIM, HIDDEN_DIM)),   "bk": w(ks[9], (1, HIDDEN_DIM)),
        "wvv": w(ks[10], (HIDDEN_DIM, HIDDEN_DIM)), "bvv": w(ks[11], (1, HIDDEN_DIM)),
        "wo": w(ks[12], (HIDDEN_DIM, HIDDEN_DIM)),  "bo": w(ks[13], (1, HIDDEN_DIM)),
        # fusion MLP
        "w1": w(ks[14], (3 * HIDDEN_DIM, 2 * HIDDEN_DIM)), "b1": w(ks[15], (1, 2 * HIDDEN_DIM)),
        "w2": w(ks[16], (2 * HIDDEN_DIM, HIDDEN_DIM)),     "b2": w(ks[17], (1, HIDDEN_DIM)),
        # LayerNorm
        "gamma": (1.0 + 0.1 * jax.random.normal(ks[18], (1, HIDDEN_DIM))).astype(jnp.float32),
        "beta": w(ks[19], (1, HIDDEN_DIM)),
    }


def reference(params, text, vision, audio):
    """Pure-JAX reference matching the PyTorch forward (eval mode), f32-accurate."""
    with jax.default_matmul_precision("float32"):
        def lin(x, wk, bk):
            return x @ params[wk] + params[bk][0]

        t = lin(text, "wt", "bt")
        v = lin(vision, "wv", "bv")
        a = lin(audio, "wa", "ba")
        x = jnp.stack([t, v, a], axis=1)                       # [B, 3, H]
        q = lin(x, "wq", "bq")
        k = lin(x, "wk", "bk")
        vv = lin(x, "wvv", "bvv")
        B, S, H = x.shape
        qh = q.reshape(B, S, NUM_HEADS, HEAD_DIM)
        kh = k.reshape(B, S, NUM_HEADS, HEAD_DIM)
        vh = vv.reshape(B, S, NUM_HEADS, HEAD_DIM)
        scores = jnp.einsum("bshd,bthd->bhst", qh, kh) / jnp.sqrt(float(HEAD_DIM))
        attn = jax.nn.softmax(scores, axis=-1)
        o = jnp.einsum("bhst,bthd->bshd", attn, vh).reshape(B, S, H)
        o = lin(o, "wo", "bo")
        flat = o.reshape(B, S * H)                             # [B, 3H]
        h1 = jnp.maximum(flat @ params["w1"] + params["b1"][0], 0.0)
        fused = jnp.tanh(h1 @ params["w2"] + params["b2"][0])
        mean = fused.mean(-1, keepdims=True)
        var = ((fused - mean) ** 2).mean(-1, keepdims=True)
        normed = (fused - mean) / jnp.sqrt(var + LN_EPS)
        return normed * params["gamma"][0] + params["beta"][0]


if __name__ == "__main__":
    key = jax.random.PRNGKey(0)
    k_param, k_text, k_vis, k_aud = jax.random.split(key, 4)
    params = init_params(k_param)
    prepared = prepare_params(params)

    batch = 2
    text = jax.random.normal(k_text, (batch, TEXT_DIM), dtype=jnp.float32)
    vision = jax.random.normal(k_vis, (batch, VISION_DIM), dtype=jnp.float32)
    audio = jax.random.normal(k_aud, (batch, AUDIO_DIM), dtype=jnp.float32)

    out = jax.block_until_ready(attention_fusion(prepared, text, vision, audio))
    ref = jax.block_until_ready(reference(params, text, vision, audio))

    assert out.shape == (batch, HIDDEN_DIM)
    # Kernel uses single-pass bf16 MXU matmuls (reference is f32-accurate); the
    # trailing LayerNorm amplifies relative error, so compare with a tolerance
    # that leaves headroom for bf16 rounding.
    max_err = jnp.max(jnp.abs(out - ref))
    assert jnp.allclose(out, ref, rtol=2e-2, atol=2e-2), f"max abs err {max_err}"
    print("KERNEL_OK")
</pallas_src>

<mosaic_0001>
module attributes {stable_mosaic.version = 11 : i64} {
  func.func @attention_fusion_kernel(%arg0: i32, %arg1: memref<8x144xf32, #tpu.memory_space<vmem>>, %arg2: memref<144x192xbf16, #tpu.memory_space<vmem>>, %arg3: memref<1x192xf32, #tpu.memory_space<vmem>>, %arg4: memref<144x192xbf16, #tpu.memory_space<vmem>>, %arg5: memref<1x192xf32, #tpu.memory_space<vmem>>, %arg6: memref<3x144x192xbf16, #tpu.memory_space<vmem>>, %arg7: memref<3x1x192xf32, #tpu.memory_space<vmem>>, %arg8: memref<192x24xbf16, #tpu.memory_space<vmem>>, %arg9: memref<24x24xbf16, #tpu.memory_space<vmem>>, %arg10: memref<24x192xbf16, #tpu.memory_space<vmem>>, %arg11: memref<3x192x128xbf16, #tpu.memory_space<vmem>>, %arg12: memref<1x128xf32, #tpu.memory_space<vmem>>, %arg13: memref<128x64xbf16, #tpu.memory_space<vmem>>, %arg14: memref<1x64xf32, #tpu.memory_space<vmem>>, %arg15: memref<1x64xf32, #tpu.memory_space<vmem>>, %arg16: memref<1x64xf32, #tpu.memory_space<vmem>>, %arg17: memref<8x64xf32, #tpu.memory_space<vmem>>) attributes {dimension_semantics = [#tpu.dimension_semantics<parallel>], iteration_bounds = array<i64: 2>, scalar_prefetch = 0 : i64, scratch_operands = 0 : i64, tpu.core_type = #tpu.core_type<tc>, window_params = [{transform_indices = @transform_0, window_bounds = array<i64: 8, 144>}, {pipeline_mode = #tpu.pipeline_mode<synchronous>, transform_indices = @transform_1, window_bounds = array<i64: 144, 192>}, {pipeline_mode = #tpu.pipeline_mode<synchronous>, transform_indices = @transform_2, window_bounds = array<i64: 1, 192>}, {pipeline_mode = #tpu.pipeline_mode<synchronous>, transform_indices = @transform_3, window_bounds = array<i64: 144, 192>}, {pipeline_mode = #tpu.pipeline_mode<synchronous>, transform_indices = @transform_4, window_bounds = array<i64: 1, 192>}, {pipeline_mode = #tpu.pipeline_mode<synchronous>, transform_indices = @transform_5, window_bounds = array<i64: 3, 144, 192>}, {pipeline_mode = #tpu.pipeline_mode<synchronous>, transform_indices = @transform_6, window_bounds = array<i64: 3, 1, 192>}, {pipeline_mode = #tpu.pipeline_mode<synchronous>, transform_indices = @transform_7, window_bounds = array<i64: 192, 24>}, {pipeline_mode = #tpu.pipeline_mode<synchronous>, transform_indices = @transform_8, window_bounds = array<i64: 24, 24>}, {pipeline_mode = #tpu.pipeline_mode<synchronous>, transform_indices = @transform_9, window_bounds = array<i64: 24, 192>}, {pipeline_mode = #tpu.pipeline_mode<synchronous>, transform_indices = @transform_10, window_bounds = array<i64: 3, 192, 128>}, {pipeline_mode = #tpu.pipeline_mode<synchronous>, transform_indices = @transform_11, window_bounds = array<i64: 1, 128>}, {pipeline_mode = #tpu.pipeline_mode<synchronous>, transform_indices = @transform_12, window_bounds = array<i64: 128, 64>}, {pipeline_mode = #tpu.pipeline_mode<synchronous>, transform_indices = @transform_13, window_bounds = array<i64: 1, 64>}, {pipeline_mode = #tpu.pipeline_mode<synchronous>, transform_indices = @transform_14, window_bounds = array<i64: 1, 64>}, {pipeline_mode = #tpu.pipeline_mode<synchronous>, transform_indices = @transform_15, window_bounds = array<i64: 1, 64>}, {transform_indices = @transform_16, window_bounds = array<i64: 8, 64>}]} {
    %c0 = arith.constant 0 : index
    %c0_0 = arith.constant 0 : index
    %0 = vector.load %arg1[%c0, %c0_0] : memref<8x144xf32, #tpu.memory_space<vmem>>, vector<8x144xf32>
    %1 = arith.truncf %0 : vector<8x144xf32> to vector<8x144xbf16>
    %c0_1 = arith.constant 0 : index
    %c0_2 = arith.constant 0 : index
    %2 = vector.load %arg2[%c0_1, %c0_2] : memref<144x192xbf16, #tpu.memory_space<vmem>>, vector<144x192xbf16>
    %cst = arith.constant dense<0.000000e+00> : vector<8x192xf32>
    %3 = tpu.matmul %1, %2, %cst {dimension_numbers = #tpu.dot_dimension_numbers<[1], [0], [0], [1], [0, 0, 1, 1], [], []>} : vector<8x144xbf16>, vector<144x192xbf16>, vector<8x192xf32> -> vector<8x192xf32>
    %c0_3 = arith.constant 0 : index
    %c0_4 = arith.constant 0 : index
    %4 = vector.load %arg3[%c0_3, %c0_4] : memref<1x192xf32, #tpu.memory_space<vmem>>, vector<1x192xf32>
    %5 = vector.broadcast %4 : vector<1x192xf32> to vector<8x192xf32>
    %6 = arith.addf %3, %5 : vector<8x192xf32>
    %c0_5 = arith.constant 0 : index
    %c0_6 = arith.constant 0 : index
    %7 = vector.load %arg4[%c0_5, %c0_6] : memref<144x192xbf16, #tpu.memory_space<vmem>>, vector<144x192xbf16>
    %cst_7 = arith.constant dense<0.000000e+00> : vector<8x192xf32>
    %8 = tpu.matmul %1, %7, %cst_7 {dimension_numbers = #tpu.dot_dimension_numbers<[1], [0], [0], [1], [0, 0, 1, 1], [], []>} : vector<8x144xbf16>, vector<144x192xbf16>, vector<8x192xf32> -> vector<8x192xf32>
    %c0_8 = arith.constant 0 : index
    %c0_9 = arith.constant 0 : index
    %9 = vector.load %arg5[%c0_8, %c0_9] : memref<1x192xf32, #tpu.memory_space<vmem>>, vector<1x192xf32>
    %10 = vector.broadcast %9 : vector<1x192xf32> to vector<8x192xf32>
    %11 = arith.addf %8, %10 : vector<8x192xf32>
    %c0_10 = arith.constant 0 : index
    %c0_11 = arith.constant 0 : index
    %12 = vector.load %arg8[%c0_10, %c0_11] : memref<192x24xbf16, #tpu.memory_space<vmem>>, vector<192x24xbf16>
    %c0_12 = arith.constant 0 : index
    %c0_13 = arith.constant 0 : index
    %13 = vector.load %arg9[%c0_12, %c0_13] : memref<24x24xbf16, #tpu.memory_space<vmem>>, vector<24x24xbf16>
    %c0_14 = arith.constant 0 : index
    %c0_15 = arith.constant 0 : index
    %14 = vector.load %arg10[%c0_14, %c0_15] : memref<24x192xbf16, #tpu.memory_space<vmem>>, vector<24x192xbf16>
    %c0_16 = arith.constant 0 : index
    %c0_17 = arith.constant 0 : index
    %15 = vector.load %arg12[%c0_16, %c0_17] : memref<1x128xf32, #tpu.memory_space<vmem>>, vector<1x128xf32>
    %c0_18 = arith.constant 0 : index
    %c0_19 = arith.constant 0 : index
    %c0_20 = arith.constant 0 : index
    %16 = vector.load %arg6[%c0_18, %c0_19, %c0_20] : memref<3x144x192xbf16, #tpu.memory_space<vmem>>, vector<1x144x192xbf16>
    %17 = vector.shape_cast %16 : vector<1x144x192xbf16> to vector<144x192xbf16>
    %cst_21 = arith.constant dense<0.000000e+00> : vector<8x192xf32>
    %18 = tpu.matmul %1, %17, %cst_21 {dimension_numbers = #tpu.dot_dimension_numbers<[1], [0], [0], [1], [0, 0, 1, 1], [], []>} : vector<8x144xbf16>, vector<144x192xbf16>, vector<8x192xf32> -> vector<8x192xf32>
    %c0_22 = arith.constant 0 : index
    %c0_23 = arith.constant 0 : index
    %c0_24 = arith.constant 0 : index
    %19 = vector.load %arg7[%c0_22, %c0_23, %c0_24] : memref<3x1x192xf32, #tpu.memory_space<vmem>>, vector<1x1x192xf32>
    %20 = vector.shape_cast %19 : vector<1x1x192xf32> to vector<1x192xf32>
    %21 = vector.broadcast %20 : vector<1x192xf32> to vector<8x192xf32>
    %22 = arith.addf %18, %21 : vector<8x192xf32>
    %23 = arith.mulf %22, %6 : vector<8x192xf32>
    %24 = arith.truncf %23 : vector<8x192xf32> to vector<8x192xbf16>
    %25 = arith.extf %24 : vector<8x192xbf16> to vector<8x192xf32>
    %26 = arith.subf %23, %25 : vector<8x192xf32>
    %27 = arith.truncf %26 : vector<8x192xf32> to vector<8x192xbf16>
    %cst_25 = arith.constant dense<0.000000e+00> : vector<8x24xf32>
    %28 = tpu.matmul %24, %12, %cst_25 {dimension_numbers = #tpu.dot_dimension_numbers<[1], [0], [0], [1], [0, 0, 1, 1], [], []>} : vector<8x192xbf16>, vector<192x24xbf16>, vector<8x24xf32> -> vector<8x24xf32>
    %cst_26 = arith.constant dense<0.000000e+00> : vector<8x24xf32>
    %29 = tpu.matmul %27, %12, %cst_26 {dimension_numbers = #tpu.dot_dimension_numbers<[1], [0], [0], [1], [0, 0, 1, 1], [], []>} : vector<8x192xbf16>, vector<192x24xbf16>, vector<8x24xf32> -> vector<8x24xf32>
    %30 = arith.addf %28, %29 : vector<8x24xf32>
    %cst_27 = arith.constant dense<0xFF800000> : vector<8xf32>
    %31 = vector.multi_reduction <maximumf>, %30, %cst_27 [1] : vector<8x24xf32> to vector<8xf32>
    %32 = vector.shape_cast %31 : vector<8xf32> to vector<8x1xf32>
    %33 = vector.broadcast %32 : vector<8x1xf32> to vector<8x24xf32>
    %34 = arith.subf %30, %33 : vector<8x24xf32>
    %35 = math.exp %34 : vector<8x24xf32>
    %36 = arith.truncf %35 : vector<8x24xf32> to vector<8x24xbf16>
    %cst_28 = arith.constant dense<0.000000e+00> : vector<8x24xf32>
    %37 = tpu.matmul %36, %13, %cst_28 {dimension_numbers = #tpu.dot_dimension_numbers<[1], [0], [0], [1], [0, 0, 1, 1], [], []>} : vector<8x24xbf16>, vector<24x24xbf16>, vector<8x24xf32> -> vector<8x24xf32>
    %38 = tpu.reciprocal %37 {approx = true} : vector<8x24xf32> -> vector<8x24xf32>
    %39 = arith.mulf %35, %38 : vector<8x24xf32>
    %40 = arith.truncf %39 : vector<8x24xf32> to vector<8x24xbf16>
    %cst_29 = arith.constant dense<0.000000e+00> : vector<8x192xf32>
    %41 = tpu.matmul %40, %14, %cst_29 {dimension_numbers = #tpu.dot_dimension_numbers<[1], [0], [0], [1], [0, 0, 1, 1], [], []>} : vector<8x24xbf16>, vector<24x192xbf16>, vector<8x192xf32> -> vector<8x192xf32>
    %42 = arith.mulf %41, %11 : vector<8x192xf32>
    %c0_30 = arith.constant 0 : index
    %c0_31 = arith.constant 0 : index
    %c0_32 = arith.constant 0 : index
    %43 = vector.load %arg11[%c0_30, %c0_31, %c0_32] : memref<3x192x128xbf16, #tpu.memory_space<vmem>>, vector<1x192x128xbf16>
    %44 = vector.shape_cast %43 : vector<1x192x128xbf16> to vector<192x128xbf16>
    %45 = arith.truncf %42 : vector<8x192xf32> to vector<8x192xbf16>
    %cst_33 = arith.constant dense<0.000000e+00> : vector<8x128xf32>
    %46 = tpu.matmul %45, %44, %cst_33 {dimension_numbers = #tpu.dot_dimension_numbers<[1], [0], [0], [1], [0, 0, 1, 1], [], []>} : vector<8x192xbf16>, vector<192x128xbf16>, vector<8x128xf32> -> vector<8x128xf32>
    %47 = vector.broadcast %15 : vector<1x128xf32> to vector<8x128xf32>
    %48 = arith.addf %47, %46 : vector<8x128xf32>
    %c1 = arith.constant 1 : index
    %c0_34 = arith.constant 0 : index
    %c0_35 = arith.constant 0 : index
    %49 = vector.load %arg6[%c1, %c0_34, %c0_35] : memref<3x144x192xbf16, #tpu.memory_space<vmem>>, vector<1x144x192xbf16>
    %50 = vector.shape_cast %49 : vector<1x144x192xbf16> to vector<144x192xbf16>
    %cst_36 = arith.constant dense<0.000000e+00> : vector<8x192xf32>
    %51 = tpu.matmul %1, %50, %cst_36 {dimension_numbers = #tpu.dot_dimension_numbers<[1], [0], [0], [1], [0, 0, 1, 1], [], []>} : vector<8x144xbf16>, vector<144x192xbf16>, vector<8x192xf32> -> vector<8x192xf32>
    %c1_37 = arith.constant 1 : index
    %c0_38 = arith.constant 0 : index
    %c0_39 = arith.constant 0 : index
    %52 = vector.load %arg7[%c1_37, %c0_38, %c0_39] : memref<3x1x192xf32, #tpu.memory_space<vmem>>, vector<1x1x192xf32>
    %53 = vector.shape_cast %52 : vector<1x1x192xf32> to vector<1x192xf32>
    %54 = vector.broadcast %53 : vector<1x192xf32> to vector<8x192xf32>
    %55 = arith.addf %51, %54 : vector<8x192xf32>
    %56 = arith.mulf %55, %6 : vector<8x192xf32>
    %57 = arith.truncf %56 : vector<8x192xf32> to vector<8x192xbf16>
    %58 = arith.extf %57 : vector<8x192xbf16> to vector<8x192xf32>
    %59 = arith.subf %56, %58 : vector<8x192xf32>
    %60 = arith.truncf %59 : vector<8x192xf32> to vector<8x192xbf16>
    %cst_40 = arith.constant dense<0.000000e+00> : vector<8x24xf32>
    %61 = tpu.matmul %57, %12, %cst_40 {dimension_numbers = #tpu.dot_dimension_numbers<[1], [0], [0], [1], [0, 0, 1, 1], [], []>} : vector<8x192xbf16>, vector<192x24xbf16>, vector<8x24xf32> -> vector<8x24xf32>
    %cst_41 = arith.constant dense<0.000000e+00> : vector<8x24xf32>
    %62 = tpu.matmul %60, %12, %cst_41 {dimension_numbers = #tpu.dot_dimension_numbers<[1], [0], [0], [1], [0, 0, 1, 1], [], []>} : vector<8x192xbf16>, vector<192x24xbf16>, vector<8x24xf32> -> vector<8x24xf32>
    %63 = arith.addf %61, %62 : vector<8x24xf32>
    %cst_42 = arith.constant dense<0xFF800000> : vector<8xf32>
    %64 = vector.multi_reduction <maximumf>, %63, %cst_42 [1] : vector<8x24xf32> to vector<8xf32>
    %65 = vector.shape_cast %64 : vector<8xf32> to vector<8x1xf32>
    %66 = vector.broadcast %65 : vector<8x1xf32> to vector<8x24xf32>
    %67 = arith.subf %63, %66 : vector<8x24xf32>
    %68 = math.exp %67 : vector<8x24xf32>
    %69 = arith.truncf %68 : vector<8x24xf32> to vector<8x24xbf16>
    %cst_43 = arith.constant dense<0.000000e+00> : vector<8x24xf32>
    %70 = tpu.matmul %69, %13, %cst_43 {dimension_numbers = #tpu.dot_dimension_numbers<[1], [0], [0], [1], [0, 0, 1, 1], [], []>} : vector<8x24xbf16>, vector<24x24xbf16>, vector<8x24xf32> -> vector<8x24xf32>
    %71 = tpu.reciprocal %70 {approx = true} : vector<8x24xf32> -> vector<8x24xf32>
    %72 = arith.mulf %68, %71 : vector<8x24xf32>
    %73 = arith.truncf %72 : vector<8x24xf32> to vector<8x24xbf16>
    %cst_44 = arith.constant dense<0.000000e+00> : vector<8x192xf32>
    %74 = tpu.matmul %73, %14, %cst_44 {dimension_numbers = #tpu.dot_dimension_numbers<[1], [0], [0], [1], [0, 0, 1, 1], [], []>} : vector<8x24xbf16>, vector<24x192xbf16>, vector<8x192xf32> -> vector<8x192xf32>
    %75 = arith.mulf %74, %11 : vector<8x192xf32>
    %c1_45 = arith.constant 1 : index
    %c0_46 = arith.constant 0 : index
    %c0_47 = arith.constant 0 : index
    %76 = vector.load %arg11[%c1_45, %c0_46, %c0_47] : memref<3x192x128xbf16, #tpu.memory_space<vmem>>, vector<1x192x128xbf16>
    %77 = vector.shape_cast %76 : vector<1x192x128xbf16> to vector<192x128xbf16>
    %78 = arith.truncf %75 : vector<8x192xf32> to vector<8x192xbf16>
    %cst_48 = arith.constant dense<0.000000e+00> : vector<8x128xf32>
    %79 = tpu.matmul %78, %77, %cst_48 {dimension_numbers = #tpu.dot_dimension_numbers<[1], [0], [0], [1], [0, 0, 1, 1], [], []>} : vector<8x192xbf16>, vector<192x128xbf16>, vector<8x128xf32> -> vector<8x128xf32>
    %80 = arith.addf %48, %79 : vector<8x128xf32>
    %c2 = arith.constant 2 : index
    %c0_49 = arith.constant 0 : index
    %c0_50 = arith.constant 0 : index
    %81 = vector.load %arg6[%c2, %c0_49, %c0_50] : memref<3x144x192xbf16, #tpu.memory_space<vmem>>, vector<1x144x192xbf16>
    %82 = vector.shape_cast %81 : vector<1x144x192xbf16> to vector<144x192xbf16>
    %cst_51 = arith.constant dense<0.000000e+00> : vector<8x192xf32>
    %83 = tpu.matmul %1, %82, %cst_51 {dimension_numbers = #tpu.dot_dimension_numbers<[1], [0], [0], [1], [0, 0, 1, 1], [], []>} : vector<8x144xbf16>, vector<144x192xbf16>, vector<8x192xf32> -> vector<8x192xf32>
    %c2_52 = arith.constant 2 : index
    %c0_53 = arith.constant 0 : index
    %c0_54 = arith.constant 0 : index
    %84 = vector.load %arg7[%c2_52, %c0_53, %c0_54] : memref<3x1x192xf32, #tpu.memory_space<vmem>>, vector<1x1x192xf32>
    %85 = vector.shape_cast %84 : vector<1x1x192xf32> to vector<1x192xf32>
    %86 = vector.broadcast %85 : vector<1x192xf32> to vector<8x192xf32>
    %87 = arith.addf %83, %86 : vector<8x192xf32>
    %88 = arith.mulf %87, %6 : vector<8x192xf32>
    %89 = arith.truncf %88 : vector<8x192xf32> to vector<8x192xbf16>
    %90 = arith.extf %89 : vector<8x192xbf16> to vector<8x192xf32>
    %91 = arith.subf %88, %90 : vector<8x192xf32>
    %92 = arith.truncf %91 : vector<8x192xf32> to vector<8x192xbf16>
    %cst_55 = arith.constant dense<0.000000e+00> : vector<8x24xf32>
    %93 = tpu.matmul %89, %12, %cst_55 {dimension_numbers = #tpu.dot_dimension_numbers<[1], [0], [0], [1], [0, 0, 1, 1], [], []>} : vector<8x192xbf16>, vector<192x24xbf16>, vector<8x24xf32> -> vector<8x24xf32>
    %cst_56 = arith.constant dense<0.000000e+00> : vector<8x24xf32>
    %94 = tpu.matmul %92, %12, %cst_56 {dimension_numbers = #tpu.dot_dimension_numbers<[1], [0], [0], [1], [0, 0, 1, 1], [], []>} : vector<8x192xbf16>, vector<192x24xbf16>, vector<8x24xf32> -> vector<8x24xf32>
    %95 = arith.addf %93, %94 : vector<8x24xf32>
    %cst_57 = arith.constant dense<0xFF800000> : vector<8xf32>
    %96 = vector.multi_reduction <maximumf>, %95, %cst_57 [1] : vector<8x24xf32> to vector<8xf32>
    %97 = vector.shape_cast %96 : vector<8xf32> to vector<8x1xf32>
    %98 = vector.broadcast %97 : vector<8x1xf32> to vector<8x24xf32>
    %99 = arith.subf %95, %98 : vector<8x24xf32>
    %100 = math.exp %99 : vector<8x24xf32>
    %101 = arith.truncf %100 : vector<8x24xf32> to vector<8x24xbf16>
    %cst_58 = arith.constant dense<0.000000e+00> : vector<8x24xf32>
    %102 = tpu.matmul %101, %13, %cst_58 {dimension_numbers = #tpu.dot_dimension_numbers<[1], [0], [0], [1], [0, 0, 1, 1], [], []>} : vector<8x24xbf16>, vector<24x24xbf16>, vector<8x24xf32> -> vector<8x24xf32>
    %103 = tpu.reciprocal %102 {approx = true} : vector<8x24xf32> -> vector<8x24xf32>
    %104 = arith.mulf %100, %103 : vector<8x24xf32>
    %105 = arith.truncf %104 : vector<8x24xf32> to vector<8x24xbf16>
    %cst_59 = arith.constant dense<0.000000e+00> : vector<8x192xf32>
    %106 = tpu.matmul %105, %14, %cst_59 {dimension_numbers = #tpu.dot_dimension_numbers<[1], [0], [0], [1], [0, 0, 1, 1], [], []>} : vector<8x24xbf16>, vector<24x192xbf16>, vector<8x192xf32> -> vector<8x192xf32>
    %107 = arith.mulf %106, %11 : vector<8x192xf32>
    %c2_60 = arith.constant 2 : index
    %c0_61 = arith.constant 0 : index
    %c0_62 = arith.constant 0 : index
    %108 = vector.load %arg11[%c2_60, %c0_61, %c0_62] : memref<3x192x128xbf16, #tpu.memory_space<vmem>>, vector<1x192x128xbf16>
    %109 = vector.shape_cast %108 : vector<1x192x128xbf16> to vector<192x128xbf16>
    %110 = arith.truncf %107 : vector<8x192xf32> to vector<8x192xbf16>
    %cst_63 = arith.constant dense<0.000000e+00> : vector<8x128xf32>
    %111 = tpu.matmul %110, %109, %cst_63 {dimension_numbers = #tpu.dot_dimension_numbers<[1], [0], [0], [1], [0, 0, 1, 1], [], []>} : vector<8x192xbf16>, vector<192x128xbf16>, vector<8x128xf32> -> vector<8x128xf32>
    %112 = arith.addf %80, %111 : vector<8x128xf32>
    %cst_64 = arith.constant 0.000000e+00 : f32
    %113 = vector.broadcast %cst_64 : f32 to vector<8x128xf32>
    %114 = arith.maximumf %112, %113 : vector<8x128xf32>
    %c0_65 = arith.constant 0 : index
    %c0_66 = arith.constant 0 : index
    %115 = vector.load %arg13[%c0_65, %c0_66] : memref<128x64xbf16, #tpu.memory_space<vmem>>, vector<128x64xbf16>
    %116 = arith.truncf %114 : vector<8x128xf32> to vector<8x128xbf16>
    %cst_67 = arith.constant dense<0.000000e+00> : vector<8x64xf32>
    %117 = tpu.matmul %116, %115, %cst_67 {dimension_numbers = #tpu.dot_dimension_numbers<[1], [0], [0], [1], [0, 0, 1, 1], [], []>} : vector<8x128xbf16>, vector<128x64xbf16>, vector<8x64xf32> -> vector<8x64xf32>
    %c0_68 = arith.constant 0 : index
    %c0_69 = arith.constant 0 : index
    %118 = vector.load %arg14[%c0_68, %c0_69] : memref<1x64xf32, #tpu.memory_space<vmem>>, vector<1x64xf32>
    %119 = vector.broadcast %118 : vector<1x64xf32> to vector<8x64xf32>
    %120 = arith.addf %117, %119 : vector<8x64xf32>
    %121 = math.tanh %120 : vector<8x64xf32>
    %cst_70 = arith.constant dense<0.000000e+00> : vector<8xf32>
    %122 = vector.multi_reduction <add>, %121, %cst_70 [1] : vector<8x64xf32> to vector<8xf32>
    %123 = vector.shape_cast %122 : vector<8xf32> to vector<8x1xf32>
    %cst_71 = arith.constant 6.400000e+01 : f32
    %124 = vector.broadcast %cst_71 : f32 to vector<8x1xf32>
    %125 = arith.divf %123, %124 : vector<8x1xf32>
    %126 = vector.broadcast %125 : vector<8x1xf32> to vector<8x64xf32>
    %127 = arith.subf %121, %126 : vector<8x64xf32>
    %128 = arith.mulf %127, %127 : vector<8x64xf32>
    %cst_72 = arith.constant dense<0.000000e+00> : vector<8xf32>
    %129 = vector.multi_reduction <add>, %128, %cst_72 [1] : vector<8x64xf32> to vector<8xf32>
    %130 = vector.shape_cast %129 : vector<8xf32> to vector<8x1xf32>
    %cst_73 = arith.constant 6.400000e+01 : f32
    %131 = vector.broadcast %cst_73 : f32 to vector<8x1xf32>
    %132 = arith.divf %130, %131 : vector<8x1xf32>
    %cst_74 = arith.constant 9.99999974E-6 : f32
    %133 = vector.broadcast %cst_74 : f32 to vector<8x1xf32>
    %134 = arith.addf %132, %133 : vector<8x1xf32>
    %135 = math.rsqrt %134 : vector<8x1xf32>
    %136 = vector.broadcast %135 : vector<8x1xf32> to vector<8x64xf32>
    %137 = arith.mulf %127, %136 : vector<8x64xf32>
    %c0_75 = arith.constant 0 : index
    %c0_76 = arith.constant 0 : index
    %138 = vector.load %arg15[%c0_75, %c0_76] : memref<1x64xf32, #tpu.memory_space<vmem>>, vector<1x64xf32>
    %139 = vector.broadcast %138 : vector<1x64xf32> to vector<8x64xf32>
    %140 = arith.mulf %137, %139 : vector<8x64xf32>
    %c0_77 = arith.constant 0 : index
    %c0_78 = arith.constant 0 : index
    %141 = vector.load %arg16[%c0_77, %c0_78] : memref<1x64xf32, #tpu.memory_space<vmem>>, vector<1x64xf32>
    %142 = vector.broadcast %141 : vector<1x64xf32> to vector<8x64xf32>
    %143 = arith.addf %140, %142 : vector<8x64xf32>
    %c0_79 = arith.constant 0 : index
    %c0_80 = arith.constant 0 : index
    %144 = vector.load %arg17[%c0_79, %c0_80] : memref<8x64xf32, #tpu.memory_space<vmem>>, vector<8x64xf32>
    tpu.vector_store %arg17[%c0_79, %c0_80], %143 {strides = array<i32>} : memref<8x64xf32, #tpu.memory_space<vmem>>, vector<8x64xf32>,
    return
  }
  func.func @transform_0(%arg0: i32) -> (i32, i32) {
    %c0_i32 = arith.constant 0 : i32
    %c0_i32_0 = arith.constant 0 : i32
    return %arg0, %c0_i32 : i32, i32
  }
  func.func @transform_1(%arg0: i32) -> (i32, i32) {
    %c0_i32 = arith.constant 0 : i32
    %c0_i32_0 = arith.constant 0 : i32
    %c0_i32_1 = arith.constant 0 : i32
    return %c0_i32, %c0_i32_0 : i32, i32
  }
  func.func @transform_2(%arg0: i32) -> (i32, i32) {
    %c0_i32 = arith.constant 0 : i32
    %c0_i32_0 = arith.constant 0 : i32
    %c0_i32_1 = arith.constant 0 : i32
    return %c0_i32, %c0_i32_0 : i32, i32
  }
  func.func @transform_3(%arg0: i32) -> (i32, i32) {
    %c0_i32 = arith.constant 0 : i32
    %c0_i32_0 = arith.constant 0 : i32
    %c0_i32_1 = arith.constant 0 : i32
    return %c0_i32, %c0_i32_0 : i32, i32
  }
  func.func @transform_4(%arg0: i32) -> (i32, i32) {
    %c0_i32 = arith.constant 0 : i32
    %c0_i32_0 = arith.constant 0 : i32
    %c0_i32_1 = arith.constant 0 : i32
    return %c0_i32, %c0_i32_0 : i32, i32
  }
  func.func @transform_5(%arg0: i32) -> (i32, i32, i32) {
    %c0_i32 = arith.constant 0 : i32
    %c0_i32_0 = arith.constant 0 : i32
    %c0_i32_1 = arith.constant 0 : i32
    %c0_i32_2 = arith.constant 0 : i32
    return %c0_i32, %c0_i32_0, %c0_i32_1 : i32, i32, i32
  }
  func.func @transform_6(%arg0: i32) -> (i32, i32, i32) {
    %c0_i32 = arith.constant 0 : i32
    %c0_i32_0 = arith.constant 0 : i32
    %c0_i32_1 = arith.constant 0 : i32
    %c0_i32_2 = arith.constant 0 : i32
    return %c0_i32, %c0_i32_0, %c0_i32_1 : i32, i32, i32
  }
  func.func @transform_7(%arg0: i32) -> (i32, i32) {
    %c0_i32 = arith.constant 0 : i32
    %c0_i32_0 = arith.constant 0 : i32
    %c0_i32_1 = arith.constant 0 : i32
    return %c0_i32, %c0_i32_0 : i32, i32
  }
  func.func @transform_8(%arg0: i32) -> (i32, i32) {
    %c0_i32 = arith.constant 0 : i32
    %c0_i32_0 = arith.constant 0 : i32
    %c0_i32_1 = arith.constant 0 : i32
    return %c0_i32, %c0_i32_0 : i32, i32
  }
  func.func @transform_9(%arg0: i32) -> (i32, i32) {
    %c0_i32 = arith.constant 0 : i32
    %c0_i32_0 = arith.constant 0 : i32
    %c0_i32_1 = arith.constant 0 : i32
    return %c0_i32, %c0_i32_0 : i32, i32
  }
  func.func @transform_10(%arg0: i32) -> (i32, i32, i32) {
    %c0_i32 = arith.constant 0 : i32
    %c0_i32_0 = arith.constant 0 : i32
    %c0_i32_1 = arith.constant 0 : i32
    %c0_i32_2 = arith.constant 0 : i32
    return %c0_i32, %c0_i32_0, %c0_i32_1 : i32, i32, i32
  }
  func.func @transform_11(%arg0: i32) -> (i32, i32) {
    %c0_i32 = arith.constant 0 : i32
    %c0_i32_0 = arith.constant 0 : i32
    %c0_i32_1 = arith.constant 0 : i32
    return %c0_i32, %c0_i32_0 : i32, i32
  }
  func.func @transform_12(%arg0: i32) -> (i32, i32) {
    %c0_i32 = arith.constant 0 : i32
    %c0_i32_0 = arith.constant 0 : i32
    %c0_i32_1 = arith.constant 0 : i32
    return %c0_i32, %c0_i32_0 : i32, i32
  }
  func.func @transform_13(%arg0: i32) -> (i32, i32) {
    %c0_i32 = arith.constant 0 : i32
    %c0_i32_0 = arith.constant 0 : i32
    %c0_i32_1 = arith.constant 0 : i32
    return %c0_i32, %c0_i32_0 : i32, i32
  }
  func.func @transform_14(%arg0: i32) -> (i32, i32) {
    %c0_i32 = arith.constant 0 : i32
    %c0_i32_0 = arith.constant 0 : i32
    %c0_i32_1 = arith.constant 0 : i32
    return %c0_i32, %c0_i32_0 : i32, i32
  }
  func.func @transform_15(%arg0: i32) -> (i32, i32) {
    %c0_i32 = arith.constant 0 : i32
    %c0_i32_0 = arith.constant 0 : i32
    %c0_i32_1 = arith.constant 0 : i32
    return %c0_i32, %c0_i32_0 : i32, i32
  }
  func.func @transform_16(%arg0: i32) -> (i32, i32) {
    %c0_i32 = arith.constant 0 : i32
    %c0_i32_0 = arith.constant 0 : i32
    return %arg0, %c0_i32 : i32, i32
  }
}

</mosaic_0001>

<bundles_post_ra>
// kernel: tpu_custom_call.1
= control target key start
LH: loop header
LB: loop body
LE: loop exit
PB: predicated region body
PF: predicated region fallthrough
CT: control target
= control target key end

     0   :  { %s4470_s0 = inlined_call_operand.vmem [shape: f32[16,144], index: 0, kind: input, shape index: {}]   ;;  %s4471_s1 = inlined_call_operand.vmem [shape: bf16[144,192], index: 1, kind: input, shape index: {}]   ;;  %s4472_s2 = inlined_call_operand.vmem [shape: f32[1,192], index: 2, kind: input, shape index: {}]   ;;  %s4473_s3 = inlined_call_operand.hbm [shape: bf16[144,192], index: 3, kind: input, shape index: {}]   ;;  %s4474_s4 = inlined_call_operand.hbm [shape: f32[1,192], index: 4, kind: input, shape index: {}]   ;;  %s4475_s5 = inlined_call_operand.hbm [shape: bf16[3,144,192], index: 5, kind: input, shape index: {}]   ;;  %s4476_s6 = inlined_call_operand.hbm [shape: f32[3,1,192], index: 6, kind: input, shape index: {}]   ;;  %s4477_s7 = inlined_call_operand.vmem [shape: bf16[192,24], index: 7, kind: input, shape index: {}]   ;;  %s4478_s8 = inlined_call_operand.hbm [shape: bf16[24,24], index: 8, kind: input, shape index: {}]   ;;  %s4479_s9 = inlined_call_operand.vmem [shape: bf16[24,192], index: 9, kind: input, shape index: {}]   ;;  %s4480_s10 = inlined_call_operand.hbm [shape: bf16[3,192,128], index: 10, kind: input, shape index: {}]   ;;  %s4481_s11 = inlined_call_operand.vmem [shape: f32[1,128], index: 11, kind: input, shape index: {}]   ;;  %s4482_s12 = inlined_call_operand.vmem [shape: bf16[128,64], index: 12, kind: input, shape index: {}]   ;;  %s4483_s13 = inlined_call_operand.vmem [shape: f32[1,64], index: 13, kind: input, shape index: {}]   ;;  %s4484_s14 = inlined_call_operand.vmem [shape: f32[1,64], index: 14, kind: input, shape index: {}]   ;;  %s4485_s15 = inlined_call_operand.vmem [shape: f32[1,64], index: 15, kind: input, shape index: {}]   ;;  %s4486_s16 = inlined_call_operand.hbm [shape: f32[16,64], index: 16, kind: output, shape index: {}]  }
   0x1   :  { %4497 = sst [smem:[#allocation25_spill]] %s4470_s0 }
   0x2   :  { %4498 = sst [smem:[#allocation26_spill]] %s4474_s4 }
   0x3   :  { %4499 = sst [smem:[#allocation27_spill]] %s4486_s16 }
   0x4   :  { %21 = vsyncpa [#allocation3], 0 }
   0x5   :  { %22 = vsyncpa [#allocation6], 0 }
   0x6   :  { %23 = vsyncpa [#allocation9], 0 }
   0x7   :  { %24 = vsyncpa [#allocation12], 0 }
   0x8   :  { %25 = vsyncpa [#allocation4], 0 }
   0x9   :  { %27 = vsyncpa [#allocation4 + $0x1], 0  ;;  %s3784_s21 = smov 0   ;;  %s3786_s22 = smov 0  }
   0xa   :  { %s3788_s23 = smov 0   ;;  %s3790_s24 = smov 0  }
   0xb LB: > { %4500 = sst [smem:[#allocation19_spill]] %s3669_s21  ;;  %s3805_s25 = sadd.s32 4294967295, %s3681_s24   ;;  %s3681_s24 = sphi %s3790_s24, %s4528_s24   ;;  %s3677_s23 = sphi %s3788_s23, %s4530_s23   ;;  %s3673_s22 = sphi %s3786_s22, %s4532_s22   ;;  %s3669_s21 = sphi %s3784_s21, %s4531_s21  }
   0xc   : > { %4501 = sst [smem:[#allocation20_spill]] %s3677_s23  ;;  %s2860_s26 = sadd.s32 4294967294, %s3681_s24  }
   0xd   : > { %4502 = sst [smem:[#allocation21_spill]] %s3681_s24  ;;  %s3809_s27 = sadd.s32 1, %s3681_s24  }
   0xe   : > { %4503 = sst [smem:[#allocation22_spill]] %s3809_s27  ;;  %s381_s28 = sadd.s32 1, %s3677_s23 }
   0xf   : > { %s378_s29 = ssub.s32 %s3681_s24, %s3809_s27  ;;  %p391_p0 = scmp.ne.s32.totalorder %s3677_s23, %s3673_s22 }
  0x10   : > { %p379_p1 = scmp.eq.s32.totalorder %s378_s29, 0  ;;  %p392_p2 = scmp.eq.s32.totalorder %s3805_s25, 1 }
  0x11   : > { %p397_p3 = scmp.ne.s32.totalorder %s3673_s22, %s3669_s21  ;;  %p398_p4 = scmp.eq.s32.totalorder %s2860_s26, 1 }
  0x12   : > { %s3820_s30 = scalar_select %p379_p1, %s3677_s23, %s381_s28  }
  0x13   : > { %p3822_p5 = por %p392_p2, %p391_p0  ;;  %p3826_p6 = por %p398_p4, %p397_p3 }
  0x14   : > { %4504 = sst [smem:[#allocation23_spill]] %s3820_s30  ;;  %p2861_p7 = scmp.ge.s32.totalorder %s3681_s24, 1 }
  0x15   : > { %s4505_s0 = scalar_select %p3822_p5, 1, 0 }
  0x16   : > { %s4506_s17 = scalar_select %p3826_p6, 1, 0 }
  0x17   : > { %p405_p8 = scmp.lt.s32.totalorder %s3681_s24, 3  ;;  %p4491_p9 = scmp.eq.s32.totalorder %s3805_s25, 0 }
  0x18   : > { %4507 = sst [smem:[#allocation24_spill]] %s4506_s17  ;;  %s3683_s19 = smov [#allocation5]  }
  0x19   : > { %p3833_p10 = pnand %p2861_p7, %p405_p8  ;;  %s437_s20 = sshll.u32 %s3683_s19, 4  ;;  %s438_s20 = int_to_ptr.vmem [resolvable:$true] %s437_s20 }
  0x1a   : > { %s3684_s26 = smov [#allocation8]   ;;  %s3685_s30 = smov [#allocation2]  }
  0x1b   : > { %s4508_s18 = scalar_select %p3833_p10, 1, 0 }
  0x1c   : > { %p3151_p11 = pneg %p3833_p10  ;;  %s460_s28 = sshll.u32 %s3684_s26, 4  ;;  %s461_s28 = int_to_ptr.vmem [resolvable:$true] %s460_s28 }
  0x1d   : > { %s423_s23 = sshll.u32 %s3685_s30, 4  ;;  %s3460_s19 = scalar_lea.vmem %s438_s20, 32  ;;  %s424_s23 = int_to_ptr.vmem [resolvable:$true] %s423_s23 }
  0x1e   : > { %p3841_p12 = pnand %p4491_p9, %p3151_p11  ;;  %p3461_p0 = scmp.ne.s32.totalorder %s438_s20, %s3460_s19 }
  0x1f   : > { %p3468_p3 = scmp.lt.s32.totalorder %s438_s20, %s438_s20  ;;  %p3469_p4 = scmp.lt.s32.totalorder %s3460_s19, %s3460_s19 }
  0x20   : > { %p3847_p13 = pneg %p3841_p12 }
  0x21   : > { %p3470_p7 = por %p3469_p4, %p3468_p3 }
  0x22   : > { %p3463_p1 = pnand %p3461_p0, %p3847_p13 }
  0x24   : > { %p3464_p2 = pneg %p3463_p1 }
  0x26   : > { %p3471_p8 = pnand %p3470_p7, %p3464_p2 }
  0x28   : > { %3474 = shalt.err (!%p3471_p8)
}
  0x29   : > { %s4511_s4 = sld [smem:[#allocation26_spill]]  ;;  %s3486_s17 = scalar_lea.vmem %s461_s28, 96 }
  0x2a   : > { %p3487_p11 = scmp.ne.s32.totalorder %s461_s28, %s3486_s17  ;;  %p3494_p5 = scmp.lt.s32.totalorder %s461_s28, %s461_s28 }
  0x2b   : > { %p3495_p0 = scmp.lt.s32.totalorder %s3486_s17, %s3486_s17 }
  0x2c   : > { %p3489_p9 = pnand %p3487_p11, %p3847_p13 }
  0x2d   : > { %p3496_p1 = por %p3495_p0, %p3494_p5 }
  0x2e   : > { %p3490_p6 = pneg %p3489_p9 }
  0x2f   : > { %3157 = dma.hbm_to_vmem [thread:$0]  (!%p3841_p12), %s4511_s4, 32, %s438_s20, [#allocation6]  }
  0x30   : > { %p3497_p10 = pnand %p3496_p1, %p3490_p6 }
  0x32   : > { %3500 = shalt.err (!%p3497_p10)
}
  0x33   : > { %s3686_s19 = smov 32   ;;  %s3687_s21 = smov 2  }
  0x34   : > { %3163 = dma.hbm_to_vmem [thread:$0]  (!%p3841_p12), %s4476_s6, 96, %s461_s28, [#allocation9], %s3686_s19, %s3686_s19, %s3687_s21  }
  0x35   : > { %s3512_s20 = scalar_lea.vmem %s424_s23, 2304  ;;  %p3520_p4 = scmp.lt.s32.totalorder %s424_s23, %s424_s23 }
  0x36   : > { %p3513_p2 = scmp.ne.s32.totalorder %s424_s23, %s3512_s20  ;;  %p3521_p7 = scmp.lt.s32.totalorder %s3512_s20, %s3512_s20 }
  0x38   : > { %p3515_p3 = pnand %p3513_p2, %p3847_p13  ;;  %p3522_p5 = por %p3521_p7, %p3520_p4 }
  0x3a   : > { %p3516_p9 = pneg %p3515_p3 }
  0x3c   : > { %p3523_p6 = pnand %p3522_p5, %p3516_p9 }
  0x3e   : > { %3526 = shalt.err (!%p3523_p6)
}
  0x3f   : > { %s3688_s17 = smov 128   ;;  %s3689_s26 = smov 8  }
  0x40   : > { %3154 = dma.hbm_to_vmem [thread:$0]  (!%p3841_p12), %s4473_s3, 2304, %s424_s23, [#allocation3], %s3688_s17, %s3688_s17, %s3689_s26  }
  0x41   : > { %s3690_s16 = smov [#allocation7]   ;;  %s3691_s24 = smov [#allocation10]  }
  0x42   : > { %s447_s21 = sshll.u32 %s3690_s16, 4  ;;  %s476_s28 = sshll.u32 %s3691_s24, 4  ;;  %s448_s21 = int_to_ptr.vmem [resolvable:$true] %s447_s21  ;;  %s477_s28 = int_to_ptr.vmem [resolvable:$true] %s476_s28 }
  0x43   : > { %s3538_s19 = scalar_lea.vmem %s448_s21, 6912  ;;  %p3546_p0 = scmp.lt.s32.totalorder %s448_s21, %s448_s21 }
  0x44   : > { %p3539_p10 = scmp.ne.s32.totalorder %s448_s21, %s3538_s19  ;;  %p3547_p1 = scmp.lt.s32.totalorder %s3538_s19, %s3538_s19 }
  0x46   : > { %p3541_p8 = pnand %p3539_p10, %p3847_p13  ;;  %p3548_p2 = por %p3547_p1, %p3546_p0 }
  0x48   : > { %p3542_p11 = pneg %p3541_p8 }
  0x4a   : > { %p3549_p3 = pnand %p3548_p2, %p3542_p11 }
  0x4c   : > { %3552 = shalt.err (!%p3549_p3)
}
  0x4d   : > { %3160 = dma.hbm_to_vmem [thread:$0]  (!%p3841_p12), %s4475_s5, 6912, %s448_s21, [#allocation6], %s3688_s17, %s3688_s17, %s3689_s26  }
  0x4e   : > { %s3564_s23 = scalar_lea.vmem %s477_s28, 192  ;;  %p3572_p5 = scmp.lt.s32.totalorder %s477_s28, %s477_s28 }
  0x4f   : > { %p3565_p9 = scmp.ne.s32.totalorder %s477_s28, %s3564_s23  ;;  %p3573_p6 = scmp.lt.s32.totalorder %s3564_s23, %s3564_s23 }
  0x51   : > { %p3567_p4 = pnand %p3565_p9, %p3847_p13  ;;  %p3574_p10 = por %p3573_p6, %p3572_p5 }
  0x53   : > { %p3568_p7 = pneg %p3567_p4 }
  0x55   : > { %p3575_p8 = pnand %p3574_p10, %p3568_p7 }
  0x57   : > { %3578 = shalt.err (!%p3575_p8)
}
  0x58   : > { %s3692_s30 = smov 64   ;;  %s3693_s16 = smov 4  }
  0x59   : > { %3166 = dma.hbm_to_vmem [thread:$0]  (!%p3841_p12), %s4478_s8, 192, %s477_s28, [#allocation9], %s3692_s30, %s3692_s30, %s3693_s16  }
  0x5a   : > { %s3694_s17 = smov [#allocation11]  }
  0x5b   : > { %s492_s26 = sshll.u32 %s3694_s17, 4  ;;  %s493_s26 = int_to_ptr.vmem [resolvable:$true] %s492_s26 }
  0x5c   : > { %s3590_s21 = scalar_lea.vmem %s493_s26, 4608  ;;  %p3598_p2 = scmp.lt.s32.totalorder %s493_s26, %s493_s26 }
  0x5d   : > { %p3591_p11 = scmp.ne.s32.totalorder %s493_s26, %s3590_s21  ;;  %p3599_p3 = scmp.lt.s32.totalorder %s3590_s21, %s3590_s21 }
  0x5f   : > { %p3593_p0 = pnand %p3591_p11, %p3847_p13  ;;  %p3600_p9 = por %p3599_p3, %p3598_p2 }
  0x61   : > { %p3594_p1 = pneg %p3593_p0 }
  0x63   : > { %p3601_p4 = pnand %p3600_p9, %p3594_p1 }
  0x65   : > { %3604 = shalt.err (!%p3601_p4)
}
  0x66   : > { %3169 = dma.hbm_to_vmem [thread:$0]  (!%p3841_p12), %s4480_s10, 4608, %s493_s26, [#allocation12], %s3692_s30, %s3692_s30, %s3693_s16  }
  0x67   : > { %p4512_p7 = scmp.ne.s32.totalorder %s4508_s18, 0 }
  0x68   : > { %p4513_p5 = scmp.eq.s32.totalorder (!%p4512_p7), %s3805_s25, 0 }
  0x69   : > { %531 = sbr.rel (%p4512_p7) target bundleno = 3521 (0xdc1), region = 84 }
  0x6e   : > { %3648 = dma.done.wait (%p4513_p5), [#allocation3], 2304   ;;  %p4514_p13 = pmov %p4513_p5 }
  0x6f   : > { %p4515_p6 = pmov %p4513_p5 }
  0x70   : > { %3650 = vsyncadd (%p4514_p13), [#allocation3], 4294964992 }
  0x71   : > { %3652 = dma.done.wait (%p4515_p6), [#allocation6], 6944   ;;  %p4516_p10 = pmov %p4513_p5 }
  0x72   : > { %p4517_p8 = pmov %p4513_p5 }
  0x73   : > { %3654 = vsyncadd (%p4516_p10), [#allocation6], 4294960352 }
  0x74   : > { %3656 = dma.done.wait (%p4517_p8), [#allocation9], 288   ;;  %p4518_p12 = pmov %p4513_p5 }
  0x75   : > { %p4519_p11 = pmov %p4513_p5 }
  0x76   : > { %3658 = vsyncadd (%p4518_p12), [#allocation9], 4294967008 }
  0x77   : > { %3660 = dma.done.wait (%p4519_p11), [#allocation12], 4608   ;;  %p4520_p0 = pmov %p4513_p5 }
  0x78   : > { %p601_p1 = scmp.lt.s32.totalorder %s3805_s25, 1  ;;  %v3234_v0 = vld [vmem:[%s4471_s1 + $0x74] ss:$8 sps:$4 sm:$0xff]   ;;  %v3236_v1 = vld [vmem:[%s4471_s1 + $0x70] ss:$8 sps:$4 sm:$0xff]   ;;  %s4521_s23 = sld [smem:[#allocation25_spill]] }
  0x79   : > { %3662 = vsyncadd (%p4520_p0), [#allocation12], 4294962688  ;;  %735 = vmatprep.subr.bf16.mxu0 %v3234_v0  ;;  %v3237_v2 = vld [vmem:[%s4471_s1 + $0x64] ss:$8 sps:$4 sm:$0xff]   ;;  %v3239_v3 = vld [vmem:[%s4471_s1 + $0x60] ss:$8 sps:$4 sm:$0xff]  }
  0x7a   : > { %s602_s16 = scalar_select %p601_p1, %s3805_s25, 1  ;;  %736 = vmatpush1.bf16.msra.mxu0 %v3236_v1  ;;  %v3240_v4 = vld [vmem:[%s4471_s1 + $0x54] ss:$8 sps:$4 sm:$0xff]   ;;  %v3242_v5 = vld [vmem:[%s4471_s1 + $0x50] ss:$8 sps:$4 sm:$0xff]   ;;  %vm731_vm0 = vcmask 130048  }
  0x7b   : > { %737 = vmatprep.subr.bf16.mxu0 %v3237_v2  ;;  %v3243_v6 = vld [vmem:[%s4471_s1 + $0x44] ss:$8 sps:$4 sm:$0xff]   ;;  %v3245_v7 = vld [vmem:[%s4471_s1 + $0x40] ss:$8 sps:$4 sm:$0xff]   ;;  %v3246_v8 = vld [vmem:[%s4471_s1 + $0x34] ss:$8 sps:$4 sm:$0xff]  }
  0x7c   : > { %s3062_s21 = sshll.u32 %s602_s16, 4  ;;  %v3248_v11 = vld [vmem:[%s4471_s1 + $0x30] ss:$8 sps:$4 sm:$0xff]   ;;  %v3249_v12 = vld [vmem:[%s4471_s1 + $0x24] ss:$8 sps:$4 sm:$0xff]   ;;  %v3695_v57 = vmov 0  }
  0x7d   : > { %v3251_v13 = vld [vmem:[%s4471_s1 + $0x20] ss:$8 sps:$4 sm:$0xff]   ;;  %v3252_v14 = vld [vmem:[%s4471_s1 + $0x14] ss:$8 sps:$4 sm:$0xff]   ;;  %v3254_v15 = vld [vmem:[%s4471_s1 + $0x10] ss:$8 sps:$4 sm:$0xff]  }
  0x7e   : > { %738 = vmatpush1.bf16.msra.mxu0 %v3239_v3  ;;  %s3937_s30 = scalar_lea.vmem %s4521_s23, %s3062_s21  ;;  %v3255_v16 = vld [vmem:[%s4471_s1 + $0x4] ss:$8 sps:$4 sm:$0xff]   ;;  %v3288_v17 = vld [vmem:[#allocation2 + $0x74] ss:$8 sps:$4 sm:$0xff]   ;;  %v3290_v18 = vld [vmem:[#allocation2 + $0x70] ss:$8 sps:$4 sm:$0xff]  }
  0x7f   : > { %739 = vmatprep.subr.bf16.mxu0 %v3240_v4  ;;  %v608_v9 = vld [vmem:[%s3937_s30 + $0x8] sm:$0xff]  ;;  %896 = vmatprep.subr.bf16.mxu1 %v3288_v17  ;;  %v3294_v23 = vld [vmem:[#allocation2 + $0x54] ss:$8 sps:$4 sm:$0xff]   ;;  %v607_v25 = vld [vmem:[%s3937_s30] sm:$0xff]  ;;  %vm1211_vm1 = vcmask 523264   ;;  %vm1298_vm2 = vcmask 195584  }
  0x80   : > { %v3946_v10 = vpack.c.bf16 %v608_v9, %v608_v9  ;;  %v3291_v19 = vld [vmem:[#allocation2 + $0x64] ss:$8 sps:$4 sm:$0xff]   ;;  %v3257_v20 = vld [vmem:[%s4471_s1] ss:$8 sps:$4 sm:$0xff]   ;;  %897 = vmatpush1.bf16.msra.mxu1 %v3290_v18  ;;  %v3296_v27 = vld [vmem:[#allocation2 + $0x50] ss:$8 sps:$4 sm:$0xff]   ;;  %v3980_v29 = vpack.c.bf16 %v607_v25, %v607_v25 }
  0x81   : > { %v3258_v21 = vld [vmem:[%s4471_s1 + $0x84] ss:$8 sps:$4 sm:$0xff]   ;;  %v3293_v22 = vld [vmem:[#allocation2 + $0x60] ss:$8 sps:$4 sm:$0xff]   ;;  %898 = vmatprep.subr.bf16.mxu1 %v3291_v19  ;;  %v3264_v33 = vld [vmem:[#allocation7 + $0x60] ss:$8 sps:$4 sm:$0xff]  }
  0x82   : > { %740 = vmatpush1.bf16.msra.mxu0 %v3242_v5  ;;  %2897 = vmatprep.mubr.msk.bf16.mxu0 %vm731_vm0, %v3946_v10  ;;  %v3260_v24 = vld [vmem:[%s4471_s1 + $0x80] ss:$8 sps:$4 sm:$0xff]   ;;  %v3297_v28 = vld [vmem:[#allocation2 + $0x44] ss:$8 sps:$4 sm:$0xff]   ;;  %v3300_v34 = vld [vmem:[#allocation2 + $0x34] ss:$8 sps:$4 sm:$0xff]  }
  0x83   : > { %741 = vmatprep.subr.bf16.mxu0 %v3243_v6  ;;  %2916 = vmatprep.mubr.msk.bf16.mxu1 %vm731_vm0, %v3946_v10  ;;  %v3263_v26 = vld [vmem:[#allocation7 + $0x74] ss:$8 sps:$4 sm:$0xff]   ;;  %v3261_v30 = vld [vmem:[#allocation7 + $0x70] ss:$8 sps:$4 sm:$0xff]   ;;  %v3266_v31 = vld [vmem:[#allocation7 + $0x64] ss:$8 sps:$4 sm:$0xff]  }
  0x84   : > { %899 = vmatpush1.bf16.msra.mxu1 %v3293_v22  ;;  %v3299_v32 = vld [vmem:[#allocation2 + $0x40] ss:$8 sps:$4 sm:$0xff]   ;;  %v3302_v36 = vld [vmem:[#allocation2 + $0x30] ss:$8 sps:$4 sm:$0xff]   ;;  %v3303_v37 = vld [vmem:[#allocation2 + $0x24] ss:$8 sps:$4 sm:$0xff]  }
  0x85   : > { %900 = vmatprep.subr.bf16.mxu1 %v3294_v23  ;;  %v3269_v35 = vld [vmem:[#allocation7 + $0x54] ss:$8 sps:$4 sm:$0xff]   ;;  %v3267_v38 = vld [vmem:[#allocation7 + $0x50] ss:$8 sps:$4 sm:$0xff]   ;;  %v3272_v39 = vld [vmem:[#allocation7 + $0x44] ss:$8 sps:$4 sm:$0xff]  }
  0x86   : > { %742 = vmatpush1.bf16.msra.mxu0 %v3245_v7  ;;  %v3305_v40 = vld [vmem:[#allocation2 + $0x20] ss:$8 sps:$4 sm:$0xff]   ;;  %v3306_v41 = vld [vmem:[#allocation2 + $0x14] ss:$8 sps:$4 sm:$0xff]   ;;  %v3308_v44 = vld [vmem:[#allocation2 + $0x10] ss:$8 sps:$4 sm:$0xff]  }
  0x87   : > { %743 = vmatprep.subr.bf16.mxu0 %v3246_v8  ;;  %v3270_v42 = vld [vmem:[#allocation7 + $0x40] ss:$8 sps:$4 sm:$0xff]   ;;  %v3275_v43 = vld [vmem:[#allocation7 + $0x34] ss:$8 sps:$4 sm:$0xff]   ;;  %v3273_v46 = vld [vmem:[#allocation7 + $0x30] ss:$8 sps:$4 sm:$0xff]  }
  0x88   : > { %901 = vmatpush1.bf16.msra.mxu1 %v3296_v27  ;;  %v3309_v45 = vld [vmem:[#allocation2 + $0x4] ss:$8 sps:$4 sm:$0xff]   ;;  %v3278_v47 = vld [vmem:[#allocation7 + $0x24] ss:$8 sps:$4 sm:$0xff]   ;;  %v3276_v50 = vld [vmem:[#allocation7 + $0x20] ss:$8 sps:$4 sm:$0xff]  }
  0x89   : > { %902 = vmatprep.subr.bf16.mxu1 %v3297_v28  ;;  %v3311_v48 = vld [vmem:[#allocation2] ss:$8 sps:$4 sm:$0xff]   ;;  %v3312_v49 = vld [vmem:[#allocation2 + $0x84] ss:$8 sps:$4 sm:$0xff]   ;;  %v3988_v55 = vld [vmem:[%s4477_s7 + $0x38] sm:$0xff]   ;;  %vm1318_vm3 = vcmask 1043456  }
  0x8a   : > { %744 = vmatpush1.bf16.msra.mxu0 %v3248_v11  ;;  %v3281_v51 = vld [vmem:[#allocation7 + $0x14] ss:$8 sps:$4 sm:$0xff]   ;;  %v3279_v53 = vld [vmem:[#allocation7 + $0x10] ss:$8 sps:$4 sm:$0xff]   ;;  %v3284_v54 = vld [vmem:[#allocation7 + $0x4] ss:$8 sps:$4 sm:$0xff]  }
  0x8b   : > { %745 = vmatprep.subr.bf16.mxu0 %v3249_v12  ;;  %v3314_v52 = vld [vmem:[#allocation2 + $0x80] ss:$8 sps:$4 sm:$0xff]   ;;  %v3282_v56 = vld [vmem:[#allocation7] ss:$8 sps:$4 sm:$0xff]   ;;  %vm3697_vm4 = vmmov 0   ;;  %s598_s4 = sand.u32 1, %s3673_s22  }
  0x8c   : > { %903 = vmatpush1.bf16.msra.mxu1 %v3299_v32  ;;  %v3287_v58 = vld [vmem:[#allocation7 + $0x84] ss:$8 sps:$4 sm:$0xff]   ;;  %v3285_v59 = vld [vmem:[#allocation7 + $0x80] ss:$8 sps:$4 sm:$0xff]   ;;  %v4010_v61 = vld [vmem:[%s4477_s7 + $0x28] sm:$0xff]   ;;  %s2876_s27 = sshll.u32 %s598_s4, 3 }
  0x8d   : > { %904 = vmatprep.subr.bf16.mxu1 %v3300_v34  ;;  %v4001_v60 = vld [vmem:[%s4477_s7 + $0x30] sm:$0xff]   ;;  %v4016_v62 = vld [vmem:[%s4477_s7 + $0x20] sm:$0xff]   ;;  %v4025_v63 = vld [vmem:[%s4477_s7 + $0x18] sm:$0xff]   ;;  %s3059_s23 = sshll.u32 %s3805_s25, 7  ;;  %s600_s24 = scalar_lea.vmem [#allocation13], %s2876_s27 }
  0x8e   : > { %746 = vmatpush1.bf16.msra.mxu0 %v3251_v13  ;;  %v4034_v0 = vld [vmem:[%s4477_s7 + $0x10] sm:$0xff]   ;;  %v4043_v1 = vld [vmem:[%s4477_s7 + $0x8] sm:$0xff]   ;;  %v4052_v2 = vld [vmem:[%s4477_s7] sm:$0xff]   ;;  %v631_v13 = vlaneseq  ;;  %s2741_s19 = sshll.u32 %s600_s24, 4  ;;  %s4522_s26 = sld [smem:[#allocation27_spill]]  ;;  %s2742_s19 = int_to_ptr.vmem [resolvable:$true] %s2741_s19 }
  0x8f   : > { %747 = vmatprep.subr.bf16.mxu0 %v3252_v14  ;;  %v4061_v3 = vld [vmem:[%s4477_s7 + $0x58] sm:$0xff]   ;;  %v4070_v4 = vld [vmem:[%s4477_s7 + $0x50] sm:$0xff]   ;;  %v4082_v5 = vld [vmem:[%s4477_s7 + $0x48] sm:$0xff]   ;;  %s2728_s21 = scalar_lea.sflag [#allocation4], %s598_s4  ;;  %s3605_s30 = scalar_lea.vmem %s2742_s19, 128 }
  0x90   : > { %905 = vmatpush1.bf16.msra.mxu1 %v3302_v36  ;;  %v4091_v6 = vld [vmem:[%s4477_s7 + $0x40] sm:$0xff]   ;;  %v632_v14 = vshrl.u32 %v631_v13, 7  ;;  %p3606_p2 = scmp.ne.s32.totalorder %s2742_s19, %s3605_s30  ;;  %p4523_p3 = scmp.ne.s32.totalorder %s4505_s0, 0 }
  0x91   : > { %906 = vmatprep.subr.bf16.mxu1 %v3303_v37  ;;  %v3329_v7 = vld [vmem:[#allocation7 + $0x104] ss:$8 sps:$4 sm:$0xff]   ;;  %v3356_v13 = vld [vmem:[#allocation7 + $0x194] ss:$8 sps:$4 sm:$0xff]   ;;  %s3698_s18 = smov [#allocation13]  }
  0x92   : > { %748 = vmatpush1.bf16.msra.mxu0 %v3254_v15  ;;  %v4099_v17 = vsub.s32 0, %v632_v14  ;;  %v629_v19 = vld [vmem:[%s4472_s2] sm:$0x3]  ;;  %p3607_p9 = pnand %p3606_p2, %p4523_p3  ;;  %s3609_s29 = sshll.u32 %s3698_s18, 4  ;;  %s3610_s29 = int_to_ptr.vmem [resolvable:$false] %s3609_s29 }
  0x93   : > { %749 = vmatprep.subr.bf16.mxu0 %v3255_v16  ;;  %s3611_s25 = scalar_lea.vmem %s3610_s29, 256  ;;  %p3612_p7 = scmp.lt.s32.totalorder %s2742_s19, %s3610_s29 }
  0x94   : > { %907 = vmatpush1.bf16.msra.mxu1 %v3305_v40  ;;  %v634_v23 = vrot.slane %v629_v19, %v4099_v17  ;;  %s2739_s20 = scalar_lea.hbm %s4522_s26, %s3059_s23  ;;  %p3608_p4 = pneg %p3607_p9 }
  0x95   : > { %908 = vmatprep.subr.bf16.mxu1 %v3306_v41  ;;  %v3327_v41 = vld [vmem:[#allocation7 + $0x100] ss:$8 sps:$4 sm:$0xff]   ;;  %p3613_p5 = scmp.lt.s32.totalorder %s3611_s25, %s3605_s30 }
  0x96   : > { %750 = vmatpush1.bf16.msra.mxu0 %v3257_v20  ;;  %v986_v20 = vld [vmem:[#allocation8] sm:$0x3] }
  0x97   : > { %765 = vmatprep.subr.bf16.mxu0 %v3258_v21  ;;  %v4104_v21 = vsub.s32 1, %v632_v14  ;;  %p3614_p13 = por %p3613_p5, %p3612_p7 }
  0x98   : > { %909 = vmatpush1.bf16.msra.mxu1 %v3308_v44 }
  0x99   : > { %910 = vmatprep.subr.bf16.mxu1 %v3309_v45  ;;  %v638_v25 = vrot.slane %v629_v19, %v4104_v21  ;;  %p3615_p6 = pnand %p3614_p13, %p3608_p4 }
  0x9a   : > { %766 = vmatpush2.bf16.msra.mxu0 %v3260_v24  ;;  %v991_v24 = vrot.slane %v986_v20, %v4099_v17 }
  0x9b   : > { %1088 = vmatprep.subr.bf16.mxu0 %v3263_v26  ;;  %v995_v26 = vrot.slane %v986_v20, %v4104_v21 }
  0x9c   : > { %911 = vmatpush1.bf16.msra.mxu1 %v3311_v48 }
  0x9d   : > { %768 = vmatmul.mubr.bf16.vlgmr.msra.gmra.mxu0 %v3980_v29  ;;  %926 = vmatprep.subr.bf16.mxu1 %v3312_v49 }
  0x9e   : > { %1089 = vmatpush1.bf16.msra.mxu0 %v3261_v30  ;;  %2935 = vmatprep.mubr.msk.bf16.mxu0 %vm731_vm0, %v3946_v10 }
  0x9f   : > { %1090 = vmatprep.subr.bf16.mxu0 %v3266_v31 }
  0xa0   : > { %927 = vmatpush2.bf16.msra.mxu1 %v3314_v52  ;;  %v3336_v52 = vld [vmem:[#allocation7 + $0xd0] ss:$8 sps:$4 sm:$0xff]  }
  0xa1   : > { %1215 = vmatprep.subr.bf16.mxu1 %v3695_v57 }
  0xa2   : > { %1091 = vmatpush1.bf16.msra.mxu0 %v3264_v33 }
  0xa3   : > { %1092 = vmatprep.subr.bf16.mxu0 %v3269_v35  ;;  %929 = vmatmul.mubr.bf16.vlgmr.msra.gmra.mxu1 %v3980_v29 }
  0xa4   : > { %1216 = vmatpush1.bf16.msra.mxu1 %v3988_v55 }
  0xa5   : > { %1217 = vmatprep.subr.bf16.mxu1 %v3695_v57 }
  0xa6   : > { %1093 = vmatpush1.bf16.msra.mxu0 %v3267_v38 }
  0xa7   : > { %1094 = vmatprep.subr.bf16.mxu0 %v3272_v39 }
  0xa8   : > { %1218 = vmatpush1.bf16.msra.mxu1 %v4001_v60 }
  0xa9   : > { %1219 = vmatprep.subr.bf16.mxu1 %v3695_v57 }
  0xaa   : > { %1095 = vmatpush1.bf16.msra.mxu0 %v3270_v42  ;;  %v3332_v42 = vld [vmem:[#allocation7 + $0xf4] ss:$8 sps:$4 sm:$0xff]  }
  0xab   : > { %1096 = vmatprep.subr.bf16.mxu0 %v3275_v43 }
  0xac   : > { %1220 = vmatpush1.bf16.msra.mxu1 %v4010_v61 }
  0xad   : > { %1221 = vmatprep.subr.bf16.mxu1 %v3695_v57 }
  0xae   : > { %1097 = vmatpush1.bf16.msra.mxu0 %v3273_v46  ;;  %v3330_v46 = vld [vmem:[#allocation7 + $0xf0] ss:$8 sps:$4 sm:$0xff]  }
  0xaf   : > { %1098 = vmatprep.subr.bf16.mxu0 %v3278_v47  ;;  %v3335_v47 = vld [vmem:[#allocation7 + $0xe4] ss:$8 sps:$4 sm:$0xff]  }
  0xb0   : > { %1222 = vmatpush1.bf16.msra.mxu1 %v4016_v62 }
  0xb1   : > { %1223 = vmatprep.subr.bf16.mxu1 %v3695_v57 }
  0xb2   : > { %1099 = vmatpush1.bf16.msra.mxu0 %v3276_v50  ;;  %v3333_v50 = vld [vmem:[#allocation7 + $0xe0] ss:$8 sps:$4 sm:$0xff]  }
  0xb3   : > { %1100 = vmatprep.subr.bf16.mxu0 %v3281_v51  ;;  %v3338_v51 = vld [vmem:[#allocation7 + $0xd4] ss:$8 sps:$4 sm:$0xff]  }
  0xb4   : > { %1224 = vmatpush1.bf16.msra.mxu1 %v4025_v63 }
  0xb5   : > { %1225 = vmatprep.subr.bf16.mxu1 %v3695_v57 }
  0xb6   : > { %1101 = vmatpush1.bf16.msra.mxu0 %v3279_v53  ;;  %v3341_v53 = vld [vmem:[#allocation7 + $0xc4] ss:$8 sps:$4 sm:$0xff]  }
  0xb7   : > { %1102 = vmatprep.subr.bf16.mxu0 %v3284_v54  ;;  %v3339_v54 = vld [vmem:[#allocation7 + $0xc0] ss:$8 sps:$4 sm:$0xff]  }
  0xb8   : > { %1226 = vmatpush1.bf16.msra.mxu1 %v4034_v0 }
  0xb9   : > { %1227 = vmatprep.subr.bf16.mxu1 %v3695_v57 }
  0xba   : > { %1103 = vmatpush1.bf16.msra.mxu0 %v3282_v56  ;;  %v3344_v56 = vld [vmem:[#allocation7 + $0xb4] ss:$8 sps:$4 sm:$0xff]  }
  0xbb   : > { %1118 = vmatprep.subr.bf16.mxu0 %v3287_v58  ;;  %v3342_v58 = vld [vmem:[#allocation7 + $0xb0] ss:$8 sps:$4 sm:$0xff]  }
  0xbc   : > { %1228 = vmatpush1.bf16.msra.mxu1 %v4043_v1 }
  0xbd   : > { %1229 = vmatprep.subr.bf16.mxu1 %v3695_v57 }
  0xbe   : > { %1119 = vmatpush2.bf16.msra.mxu0 %v3285_v59  ;;  %v3347_v59 = vld [vmem:[#allocation7 + $0xa4] ss:$8 sps:$4 sm:$0xff]  }
  0xbf   : > { %1258 = vmatprep.subr.bf16.mxu0 %v3695_v57 }
  0xc0   : > { %1230 = vmatpush1.bf16.msra.mxu1 %v4052_v2 }
  0xc1   : > { %1121 = vmatmul.mubr.bf16.vlgmr.msra.gmra.mxu0 %v3980_v29  ;;  %1239 = vmatprep.subr.bf16.mxu1 %v3695_v57 }
  0xc2   : > { %1259 = vmatpush1.bf16.msra.mxu0 %v3988_v55 }
  0xc3   : > { %1260 = vmatprep.subr.bf16.mxu0 %v3695_v57 }
  0xc4   : > { %1240 = vmatpush2.bf16.msra.mxu1 %v4061_v3 }
  0xc5   : > { %1241 = vmatprep.subr.bf16.mxu1 %v3695_v57 }
  0xc6   : > { %1261 = vmatpush1.bf16.msra.mxu0 %v4001_v60 }
  0xc7   : > { %1262 = vmatprep.subr.bf16.mxu0 %v3695_v57 }
  0xc8   : > { %1242 = vmatpush2.bf16.msra.mxu1 %v4070_v4 }
  0xc9   : > { %1243 = vmatprep.subr.bf16.mxu1 %v3695_v57 }
  0xca   : > { %1263 = vmatpush1.bf16.msra.mxu0 %v4010_v61 }
  0xcb   : > { %1264 = vmatprep.subr.bf16.mxu0 %v3695_v57 }
  0xcc   : > { %1244 = vmatpush2.bf16.msra.mxu1 %v4082_v5 }
  0xcd   : > { %1245 = vmatprep.subr.bf16.mxu1 %v3695_v57 }
  0xce   : > { %1265 = vmatpush1.bf16.msra.mxu0 %v4016_v62 }
  0xcf   : > { %1266 = vmatprep.subr.bf16.mxu0 %v3695_v57 }
  0xd0   : > { %1246 = vmatpush2.bf16.msra.mxu1 %v4091_v6 }
  0xd2   : > { %1267 = vmatpush1.bf16.msra.mxu0 %v4025_v63 }
  0xd3   : > { %1268 = vmatprep.subr.bf16.mxu0 %v3695_v57 }
  0xd6   : > { %1269 = vmatpush1.bf16.msra.mxu0 %v4034_v0 }
  0xd7   : > { %1270 = vmatprep.subr.bf16.mxu0 %v3695_v57 }
  0xda   : > { %1271 = vmatpush1.bf16.msra.mxu0 %v4043_v1 }
  0xdb   : > { %1272 = vmatprep.subr.bf16.mxu0 %v3695_v57 }
  0xde   : > { %1273 = vmatpush1.bf16.msra.mxu0 %v4052_v2 }
  0xdf   : > { %1282 = vmatprep.subr.bf16.mxu0 %v3695_v57 }
  0xe2   : > { %1283 = vmatpush2.bf16.msra.mxu0 %v4061_v3 }
  0xe3   : > { %1284 = vmatprep.subr.bf16.mxu0 %v3695_v57 }
  0xe6   : > { %1285 = vmatpush2.bf16.msra.mxu0 %v4070_v4 }
  0xe7   : > { %1286 = vmatprep.subr.bf16.mxu0 %v3695_v57 }
  0xea   : > { %1287 = vmatpush2.bf16.msra.mxu0 %v4082_v5 }
  0xeb   : > { %1288 = vmatprep.subr.bf16.mxu0 %v3695_v57 }
  0xee   : > { %1289 = vmatpush2.bf16.msra.mxu0 %v4091_v6 }
  0xef   : > { %1702 = vmatprep.subr.bf16.mxu0 %v3329_v7  ;;  %v3345_v7 = vld [vmem:[#allocation7 + $0xa0] ss:$8 sps:$4 sm:$0xff]  }
 0x15d   : > { %v769_v8 = vpop.f32.mrf.mxu0 }
 0x15e   : > { %v4110_v28 = vadd.f32 %v769_v8, %v634_v23  ;;  %v3350_v8 = vld [vmem:[#allocation7 + $0x94] ss:$8 sps:$4 sm:$0xff]  }
 0x15f   : > { %v771_v9 = vpop.f32.mrf.mxu0 }
 0x160   : > { %v4112_v32 = vadd.f32 %v771_v9, %v638_v25  ;;  %v3348_v9 = vld [vmem:[#allocation7 + $0x90] ss:$8 sps:$4 sm:$0xff]  }
 0x161   : > { %v773_v11 = vpop.f32.mrf.mxu0 }
 0x162   : > { %v3353_v11 = vld [vmem:[#allocation7 + $0x114] ss:$8 sps:$4 sm:$0xff]  }
 0x163   : > { %v774_v12 = vpop.f32.mrf.mxu0  ;;  %v4095_v15 = vpop.f32.mrf.mxu1 }
 0x164   : > { %v3351_v12 = vld [vmem:[#allocation7 + $0x110] ss:$8 sps:$4 sm:$0xff]  }
 0x165   : > { %v4097_v16 = vpop.f32.mrf.mxu1 }
 0x167   : > { %v934_v18 = vpop.f32.mrf.mxu1 }
 0x169   : > { %v935_v22 = vpop.f32.mrf.mxu1 }
 0x181   : > { %v1122_v27 = vpop.f32.mrf.mxu0 }
 0x182   : > { %v1123_v30 = vadd.f32 %v1122_v27, %v991_v24 }
 0x183   : > { %v1124_v31 = vpop.f32.mrf.mxu0 }
 0x184   : > { %v1129_v33 = vmul.f32 %v1123_v30, %v4110_v28  ;;  %v1125_v34 = vadd.f32 %v1124_v31, %v995_v26  ;;  %v3381_v30 = vld [vmem:[#allocation10 + $0x8] ss:$0 sps:$4 sm:$0xff]   ;;  %v3696_v31 = vmov 0.0  }
 0x185   : > { %v1126_v35 = vpop.f32.mrf.mxu0  ;;  %3081 = vmatprep.subr.bf16.mxu1 %v3696_v31 }
 0x186   : > { %v1131_v36 = vpack.c.bf16 %v1129_v33, %v1129_v33  ;;  %v1130_v37 = vmul.f32 %v1125_v34, %v4112_v32  ;;  %v4156_v34 = vld [vmem:[#allocation10] sm:$0xff]   ;;  %v1600_v35 = vld [vmem:[#allocation8 + $0x2] sm:$0x3] }
 0x187   : > { %v1127_v38 = vpop.f32.mrf.mxu0 }
 0x188   : > { %v1133_v39 = vunpack.c.l.bf16 %v1131_v36  ;;  %v1132_v40 = vpack.c.bf16 %v1130_v37, %v1130_v37 }
 0x18a   : > { %v1134_v43 = vunpack.c.l.bf16 %v1132_v40  ;;  %2949 = vmatprep.mubr.msk.bf16.mxu0 %vm1211_vm1, %v1132_v40  ;;  %v1135_v44 = vsub.f32 %v1129_v33, %v1133_v39  ;;  %v4153_v33 = vsel %vm1318_vm3, %v3381_v30, 0  ;;  %v966_v30 = vld [vmem:[%s4479_s9 + $0x10] sm:$0xff] }
 0x18b   : > { %1291 = vmatmul.mubr.bf16.vlgmr.msra.gmra.mxu0 %v1131_v36  ;;  %v1605_v36 = vrot.slane %v1600_v35, %v4099_v17 }
 0x18c   : > { %v1136_v45 = vsub.f32 %v1130_v37, %v1134_v43  ;;  %1703 = vmatpush1.bf16.msra.mxu0 %v3327_v41  ;;  %2991 = vmatprep.mubr.msk.bf16.mxu0 %vm731_vm0, %v3946_v10  ;;  %v1137_v49 = vpack.c.bf16 %v1135_v44, %v1135_v44  ;;  %v1609_v37 = vrot.slane %v1600_v35, %v4104_v21 }
 0x18d   : > { %1704 = vmatprep.subr.bf16.mxu0 %v3332_v42  ;;  %v4205_v35 = vcombine.high %v966_v30, %v966_v30 }
 0x18e   : > { %v1138_v48 = vpack.c.bf16 %v1136_v45, %v1136_v45 }
 0x190   : > { %1705 = vmatpush1.bf16.msra.mxu0 %v3330_v46  ;;  %2948 = vmatprep.mubr.msk.bf16.mxu1 %vm1211_vm1, %v1138_v48 }
 0x191   : > { %1248 = vmatmul.mubr.bf16.vlgmr.msra.gmra.mxu1 %v1137_v49  ;;  %1706 = vmatprep.subr.bf16.mxu0 %v3335_v47  ;;  %v3354_v49 = vld [vmem:[#allocation7 + $0x190] ss:$8 sps:$4 sm:$0xff]  }
 0x192   : > { %3085 = vmatprep.mubr.msk.bf16.mxu1 %vm3697_vm4, %v3696_v31  ;;  %3082 = vmatpush3.bf16.msra.mxu1 %v4153_v33 }
 0x193   : > { %3083 = vmatprep.subr.bf16.mxu1 %v3696_v31 }
 0x194   : > { %1707 = vmatpush1.bf16.msra.mxu0 %v3333_v50  ;;  %v3359_v50 = vld [vmem:[#allocation7 + $0x184] ss:$8 sps:$4 sm:$0xff]  }
 0x195   : > { %1708 = vmatprep.subr.bf16.mxu0 %v3338_v51 }
 0x196   : > { %3084 = vmatpush3.bf16.msra.mxu1 %v4156_v34 }
 0x197   : > { %2957 = vmatprep.subr.msk.bf16.mxu1 %vm1318_vm3, %v4205_v35 }
 0x198   : > { %1709 = vmatpush1.bf16.msra.mxu0 %v3336_v52 }
 0x199   : > { %1710 = vmatprep.subr.bf16.mxu0 %v3341_v53 }
 0x19c   : > { %1711 = vmatpush1.bf16.msra.mxu0 %v3339_v54  ;;  %v3357_v54 = vld [vmem:[#allocation7 + $0x180] ss:$8 sps:$4 sm:$0xff]  }
 0x19d   : > { %1712 = vmatprep.subr.bf16.mxu0 %v3344_v56  ;;  %v3362_v56 = vld [vmem:[#allocation7 + $0x174] ss:$8 sps:$4 sm:$0xff]  }
 0x1a0   : > { %1713 = vmatpush1.bf16.msra.mxu0 %v3342_v58  ;;  %v3360_v58 = vld [vmem:[#allocation7 + $0x170] ss:$8 sps:$4 sm:$0xff]  }
 0x1a1   : > { %1714 = vmatprep.subr.bf16.mxu0 %v3347_v59  ;;  %v3365_v59 = vld [vmem:[#allocation7 + $0x164] ss:$8 sps:$4 sm:$0xff]  }
 0x1a4   : > { %1715 = vmatpush1.bf16.msra.mxu0 %v3345_v7  ;;  %v3363_v7 = vld [vmem:[#allocation7 + $0x160] ss:$8 sps:$4 sm:$0xff]  }
 0x1a5   : > { %1716 = vmatprep.subr.bf16.mxu0 %v3350_v8  ;;  %v3368_v8 = vld [vmem:[#allocation7 + $0x154] ss:$8 sps:$4 sm:$0xff]  }
 0x1a8   : > { %1717 = vmatpush1.bf16.msra.mxu0 %v3348_v9  ;;  %v3366_v9 = vld [vmem:[#allocation7 + $0x150] ss:$8 sps:$4 sm:$0xff]  }
 0x1a9   : > { %1732 = vmatprep.subr.bf16.mxu0 %v3353_v11  ;;  %v3371_v11 = vld [vmem:[#allocation7 + $0x144] ss:$8 sps:$4 sm:$0xff]  }
 0x1ac   : > { %1733 = vmatpush2.bf16.msra.mxu0 %v3351_v12  ;;  %v3369_v12 = vld [vmem:[#allocation7 + $0x140] ss:$8 sps:$4 sm:$0xff]  }
 0x1ad   : > { %1799 = vmatprep.subr.bf16.mxu0 %v3695_v57 }
 0x1af   : > { %1735 = vmatmul.mubr.bf16.vlgmr.msra.gmra.mxu0 %v3980_v29 }
 0x1b0   : > { %1800 = vmatpush1.bf16.msra.mxu0 %v3988_v55 }
 0x1b1   : > { %1801 = vmatprep.subr.bf16.mxu0 %v3695_v57 }
 0x1b4   : > { %1802 = vmatpush1.bf16.msra.mxu0 %v4001_v60 }
 0x1b5   : > { %1803 = vmatprep.subr.bf16.mxu0 %v3695_v57 }
 0x1b8   : > { %1804 = vmatpush1.bf16.msra.mxu0 %v4010_v61 }
 0x1b9   : > { %1805 = vmatprep.subr.bf16.mxu0 %v3695_v57 }
 0x1bc   : > { %1806 = vmatpush1.bf16.msra.mxu0 %v4016_v62 }
 0x1bd   : > { %1807 = vmatprep.subr.bf16.mxu0 %v3695_v57 }
 0x1c0   : > { %1808 = vmatpush1.bf16.msra.mxu0 %v4025_v63 }
 0x1c1   : > { %1809 = vmatprep.subr.bf16.mxu0 %v3695_v57 }
 0x1c4   : > { %1810 = vmatpush1.bf16.msra.mxu0 %v4034_v0 }
 0x1c5   : > { %1811 = vmatprep.subr.bf16.mxu0 %v3695_v57 }
 0x1c8   : > { %1812 = vmatpush1.bf16.msra.mxu0 %v4043_v1 }
 0x1c9   : > { %1813 = vmatprep.subr.bf16.mxu0 %v3695_v57 }
 0x1cc   : > { %1814 = vmatpush1.bf16.msra.mxu0 %v4052_v2 }
 0x1cd   : > { %1823 = vmatprep.subr.bf16.mxu0 %v3695_v57 }
 0x1d0   : > { %1824 = vmatpush2.bf16.msra.mxu0 %v4061_v3 }
 0x1d1   : > { %1825 = vmatprep.subr.bf16.mxu0 %v3695_v57 }
 0x1d4   : > { %1826 = vmatpush2.bf16.msra.mxu0 %v4070_v4 }
 0x1d5   : > { %1827 = vmatprep.subr.bf16.mxu0 %v3695_v57 }
 0x1d8   : > { %1828 = vmatpush2.bf16.msra.mxu0 %v4082_v5 }
 0x1d9   : > { %1829 = vmatprep.subr.bf16.mxu0 %v3695_v57 }
 0x1dc   : > { %1830 = vmatpush2.bf16.msra.mxu0 %v4091_v6 }
 0x1dd   : > { %2203 = vmatprep.subr.bf16.mxu0 %v3356_v13  ;;  %v3374_v13 = vld [vmem:[#allocation7 + $0x134] ss:$8 sps:$4 sm:$0xff]  }
 0x24b   : > { %v1292_v14 = vpop.f32.mrf.mxu0 }
 0x24d   : > { %v1294_v18 = vpop.f32.mrf.mxu0 }
 0x24e   : > { %v3375_v18 = vld [vmem:[#allocation7 + $0x120] ss:$8 sps:$4 sm:$0xff]  }
 0x24f   : > { %v1295_v19 = vpop.f32.mrf.mxu0 }
 0x250   : > { %v3380_v19 = vld [vmem:[#allocation7 + $0x1a4] ss:$8 sps:$4 sm:$0xff]  }
 0x251   : > { %v1249_v20 = vpop.f32.mrf.mxu1  ;;  %v1296_v22 = vpop.f32.mrf.mxu0 }
 0x252   : > { %v4145_v23 = vadd.f32 %v1292_v14, %v1249_v20  ;;  %v3377_v14 = vld [vmem:[#allocation7 + $0x124] ss:$8 sps:$4 sm:$0xff]   ;;  %v3378_v20 = vld [vmem:[#allocation7 + $0x1a0] ss:$8 sps:$4 sm:$0xff]  }
 0x253   : > { %v1251_v24 = vpop.f32.mrf.mxu1 }
 0x254   : > { %v1299_v25 = vsel %vm1298_vm2, %v4145_v23, -inf }
 0x255   : > { %1300 = vmax.xlane.f32.xlu0 %v1299_v25  ;;  %v1252_v26 = vpop.f32.mrf.mxu1 }
 0x257   : > { %v1253_v27 = vpop.f32.mrf.mxu1 }
 0x26f   : > { %v1736_v38 = vpop.f32.mrf.mxu0 }
 0x270   : > { %v1737_v39 = vadd.f32 %v1736_v38, %v1605_v36  ;;  %v2955_v36 = vcombine.low %v966_v30, %v966_v30  ;;  %v3394_v30 = vld [vmem:[#allocation11 + $0x8] sm:$0xff]  }
 0x271   : > { %v1738_v40 = vpop.f32.mrf.mxu0 }
 0x272   : > { %v1743_v41 = vmul.f32 %v1737_v39, %v4110_v28  ;;  %v1739_v42 = vadd.f32 %v1738_v40, %v1609_v37  ;;  %v4215_v38 = vsel %vm1318_vm3, %v2955_v36, 0  ;;  %v4221_v40 = vld [vmem:[%s4479_s9] ss:$8 sps:$4 sm:$0xff]   ;;  %v3395_v36 = vld [vmem:[#allocation11] sm:$0xff]  }
 0x273   : > { %v1740_v43 = vpop.f32.mrf.mxu0 }
 0x274   : > { %v1745_v44 = vpack.c.bf16 %v1743_v41, %v1743_v41  ;;  %v1744_v45 = vmul.f32 %v1739_v42, %v4112_v32  ;;  %v2101_v42 = vld [vmem:[#allocation8 + $0x4] sm:$0x3] }
 0x275   : > { %v1741_v46 = vpop.f32.mrf.mxu0  ;;  %v2106_v43 = vrot.slane %v2101_v42, %v4099_v17 }
 0x276   : > { %v1747_v47 = vunpack.c.l.bf16 %v1745_v44  ;;  %v1746_v48 = vpack.c.bf16 %v1744_v45, %v1744_v45 }
 0x278   : > { %v4164_v51 = vsub.f32 %v1743_v41, %v1747_v47  ;;  %v1748_v52 = vunpack.c.l.bf16 %v1746_v48  ;;  %2993 = vmatprep.mubr.msk.bf16.mxu0 %vm1211_vm1, %v1746_v48 }
 0x279   : > { %1832 = vmatmul.mubr.bf16.vlgmr.msra.gmra.mxu0 %v1745_v44  ;;  %v2110_v44 = vrot.slane %v2101_v42, %v4104_v21  ;;  %v3399_v42 = vld [vmem:[#allocation11 + $0x40] sm:$0xff]  }
 0x27a   : > { %v4167_v53 = vsub.f32 %v1744_v45, %v1748_v52  ;;  %2204 = vmatpush1.bf16.msra.mxu0 %v3354_v49  ;;  %3028 = vmatprep.mubr.msk.bf16.mxu0 %vm731_vm0, %v3946_v10  ;;  %v3372_v10 = vld [vmem:[#allocation7 + $0x130] ss:$8 sps:$4 sm:$0xff]  }
 0x27b   : > { %2205 = vmatprep.subr.bf16.mxu0 %v3359_v50 }
 0x27e   : > { %2206 = vmatpush1.bf16.msra.mxu0 %v3357_v54 }
 0x27f   : > { %2207 = vmatprep.subr.bf16.mxu0 %v3362_v56 }
 0x282   : > { %2208 = vmatpush1.bf16.msra.mxu0 %v3360_v58 }
 0x283   : > { %2209 = vmatprep.subr.bf16.mxu0 %v3365_v59 }
 0x286   : > { %2210 = vmatpush1.bf16.msra.mxu0 %v3363_v7 }
 0x287   : > { %2211 = vmatprep.subr.bf16.mxu0 %v3368_v8 }
 0x28a   : > { %2212 = vmatpush1.bf16.msra.mxu0 %v3366_v9 }
 0x28b   : > { %2213 = vmatprep.subr.bf16.mxu0 %v3371_v11 }
 0x28e   : > { %2214 = vmatpush1.bf16.msra.mxu0 %v3369_v12 }
 0x28f   : > { %2215 = vmatprep.subr.bf16.mxu0 %v3374_v13 }
 0x292   : > { %2216 = vmatpush1.bf16.msra.mxu0 %v3372_v10 }
 0x293   : > { %2217 = vmatprep.subr.bf16.mxu0 %v3377_v14 }
 0x296   : > { %2218 = vmatpush1.bf16.msra.mxu0 %v3375_v18 }
 0x297   : > { %2233 = vmatprep.subr.bf16.mxu0 %v3380_v19  ;;  %v3388_v19 = vld [vmem:[#allocation11 + $0x38] sm:$0xff]  }
 0x29a   : > { %2234 = vmatpush2.bf16.msra.mxu0 %v3378_v20 }
 0x29b   : > { %2257 = vmatprep.subr.bf16.mxu0 %v3695_v57 }
 0x29d   : > { %2236 = vmatmul.mubr.bf16.vlgmr.msra.gmra.mxu0 %v3980_v29 }
 0x29e   : > { %2258 = vmatpush1.bf16.msra.mxu0 %v3988_v55 }
 0x29f   : > { %2259 = vmatprep.subr.bf16.mxu0 %v3695_v57 }
 0x2a2   : > { %2260 = vmatpush1.bf16.msra.mxu0 %v4001_v60 }
 0x2a3   : > { %2261 = vmatprep.subr.bf16.mxu0 %v3695_v57 }
 0x2a6   : > { %2262 = vmatpush1.bf16.msra.mxu0 %v4010_v61 }
 0x2a7   : > { %2263 = vmatprep.subr.bf16.mxu0 %v3695_v57 }
 0x2aa   : > { %2264 = vmatpush1.bf16.msra.mxu0 %v4016_v62 }
 0x2ab   : > { %2265 = vmatprep.subr.bf16.mxu0 %v3695_v57 }
 0x2ae   : > { %2266 = vmatpush1.bf16.msra.mxu0 %v4025_v63 }
 0x2af   : > { %2267 = vmatprep.subr.bf16.mxu0 %v3695_v57 }
 0x2b2   : > { %2268 = vmatpush1.bf16.msra.mxu0 %v4034_v0 }
 0x2b3   : > { %2269 = vmatprep.subr.bf16.mxu0 %v3695_v57 }
 0x2b6   : > { %2270 = vmatpush1.bf16.msra.mxu0 %v4043_v1 }
 0x2b7   : > { %2271 = vmatprep.subr.bf16.mxu0 %v3695_v57 }
 0x2ba   : > { %2272 = vmatpush1.bf16.msra.mxu0 %v4052_v2 }
 0x2bb   : > { %2281 = vmatprep.subr.bf16.mxu0 %v3695_v57 }
 0x2be   : > { %2282 = vmatpush2.bf16.msra.mxu0 %v4061_v3 }
 0x2bf   : > { %2283 = vmatprep.subr.bf16.mxu0 %v3695_v57 }
 0x2c2   : > { %2284 = vmatpush2.bf16.msra.mxu0 %v4070_v4 }
 0x2c3   : > { %2285 = vmatprep.subr.bf16.mxu0 %v3695_v57 }
 0x2c6   : > { %2286 = vmatpush2.bf16.msra.mxu0 %v4082_v5 }
 0x2c7   : > { %2287 = vmatprep.subr.bf16.mxu0 %v3695_v57 }
 0x2ca   : > { %2288 = vmatpush2.bf16.msra.mxu0 %v4091_v6 }
 0x2cb   : > { %3097 = vmatprep.subr.bf16.mxu0 %v3696_v31 }
 0x2de   : > { %v1301_v29 = vpop.xlane.xlu0 %1300 }
 0x2df   : > { %v1302_v22 = vsub.f32 %v4145_v23, %v1301_v29  ;;  %v4210_v23 = vld [vmem:[%s4479_s9 + $0x4] ss:$8 sps:$4 sm:$0xff]  }
 0x2e0   : > { %v3389_v29 = vld [vmem:[#allocation11 + $0x30] sm:$0xff]  }
 0x2e1   : > { %v1303_v24 = vmul.f32 1.442695, %v1302_v22  ;;  %v3390_v22 = vld [vmem:[#allocation11 + $0x28] sm:$0xff]  }
 0x2e3   : > { %3432 = vpow2.f32 %v1303_v24  ;;  %v3391_v24 = vld [vmem:[#allocation11 + $0x20] sm:$0xff]  }
 0x2f0   : > { %v3433_v25 = vpop.eup %3432 }
 0x2f1   : > { %v1305_v26 = vpack.c.bf16 %v3433_v25, %v3433_v25 }
 0x2f3   : > { %3086 = vmatmul.mubr.msk.bf16.vlgmr.msra.gmra.mxu1 %vm1298_vm2, %v1305_v26  ;;  %v3392_v26 = vld [vmem:[#allocation11 + $0x18] sm:$0xff]  }
 0x2f4   : > { %1421 = vmatprep.mubr.bf16.mxu1 %v3695_v57  ;;  %1402 = vmatpush1.bf16.msra.mxu1 %v4215_v38 }
 0x2f5   : > { %1403 = vmatprep.subr.bf16.mxu1 %v4210_v23 }
 0x2f8   : > { %1404 = vmatpush1.bf16.msra.mxu1 %v4221_v40 }
 0x2f9   : > { %1533 = vmatprep.subr.bf16.mxu1 %v3695_v57 }
 0x339   : > { %v4200_v27 = vpop.f32.mrf.mxu0 }
 0x33b   : > { %v1835_v37 = vpop.f32.mrf.mxu0 }
 0x33c   : > { %v3396_v37 = vld [vmem:[#allocation11 + $0x58] sm:$0xff]  }
 0x33d   : > { %v1836_v39 = vpop.f32.mrf.mxu0 }
 0x33e   : > { %v3397_v39 = vld [vmem:[#allocation11 + $0x50] sm:$0xff]  }
 0x33f   : > { %v1837_v41 = vpop.f32.mrf.mxu0 }
 0x340   : > { %v3398_v41 = vld [vmem:[#allocation11 + $0x48] sm:$0xff]  }
 0x35d   : > { %v2237_v45 = vpop.f32.mrf.mxu0 }
 0x35e   : > { %v2238_v46 = vadd.f32 %v2237_v45, %v2106_v43 }
 0x35f   : > { %v2239_v47 = vpop.f32.mrf.mxu0 }
 0x360   : > { %v2244_v48 = vmul.f32 %v2238_v46, %v4110_v28  ;;  %v2240_v49 = vadd.f32 %v2239_v47, %v2110_v44  ;;  %v794_v47 = vld [vmem:[#allocation5] sm:$0x3] }
 0x361   : > { %v2241_v50 = vpop.f32.mrf.mxu0 }
 0x362   : > { %v4229_v52 = vpack.c.bf16 %v2244_v48, %v2244_v48  ;;  %v2245_v54 = vmul.f32 %v2240_v49, %v4112_v32  ;;  %v803_v49 = vrot.slane %v794_v47, %v4104_v21 }
 0x363   : > { %v2242_v56 = vpop.f32.mrf.mxu0 }
 0x364   : > { %v2248_v58 = vunpack.c.l.bf16 %v4229_v52  ;;  %v4233_v59 = vpack.c.bf16 %v2245_v54, %v2245_v54  ;;  %v4264_v56 = vadd.f32 %v4097_v16, %v803_v49  ;;  %v3409_v49 = vld [vmem:[#allocation11 + $0xb0] sm:$0xff]  }
 0x366   : > { %v2249_v7 = vunpack.c.l.bf16 %v4233_v59  ;;  %v2250_v8 = vsub.f32 %v2244_v48, %v2248_v58  ;;  %v799_v48 = vrot.slane %v794_v47, %v4099_v17  ;;  %v1752_v17 = vpack.c.bf16 %v4167_v53, %v4167_v53  ;;  %v3407_v47 = vld [vmem:[#allocation11 + $0x60] sm:$0xff]  }
 0x368   : > { %v2251_v9 = vsub.f32 %v2245_v54, %v2249_v7  ;;  %v2252_v12 = vpack.c.bf16 %v2250_v8, %v2250_v8  ;;  %v4261_v50 = vadd.f32 %v4095_v15, %v799_v48  ;;  %v3408_v48 = vld [vmem:[#allocation11 + $0xb8] sm:$0xff]  }
 0x36a   : > { %v2253_v11 = vpack.c.bf16 %v2251_v9, %v2251_v9 }
 0x36c   : > { %3029 = vmatprep.mubr.msk.bf16.mxu0 %vm1211_vm1, %v2253_v11 }
 0x36d   : > { %2290 = vmatmul.mubr.bf16.vlgmr.msra.gmra.mxu0 %v2252_v12 }
 0x36e   : > { %3098 = vmatpush3.bf16.msra.mxu0 %v4153_v33  ;;  %3101 = vmatprep.mubr.msk.bf16.mxu0 %vm3697_vm4, %v3696_v31 }
 0x36f   : > { %3099 = vmatprep.subr.bf16.mxu0 %v3696_v31 }
 0x372   : > { %3100 = vmatpush3.bf16.msra.mxu0 %v4156_v34 }
 0x373   : > { %2541 = vmatprep.subr.bf16.mxu0 %v3695_v57 }
 0x3b3   : > { %v1356_v28 = vpop.f32.mrf.mxu1 }
 0x3b4   : > { %3434 = vrcp.f32 %v1356_v28 }
 0x3b5   : > { %v3087_v32 = vpop.f32.mrf.mxu1 }
 0x3b7   : > { %v1359_v13 = vpop.f32.mrf.mxu1 }
 0x3b9   : > { %v3088_v10 = vpop.f32.mrf.mxu1 }
 0x3c1   : > { %v3435_v14 = vpop.eup %3434 }
 0x3c2   : > { %v1363_v18 = vmul.f32 %v3435_v14, %v3433_v25  ;;  %v3393_v25 = vld [vmem:[#allocation11 + $0x10] sm:$0xff]  }
 0x3c4   : > { %v1364_v20 = vpack.c.bf16 %v1363_v18, %v1363_v18 }
 0x3c6   : > { %2958 = vmatmul.mubr.msk.bf16.vlgmr.msra.gmra.mxu1 %vm1298_vm2, %v1364_v20 }
 0x3c7   : > { %1534 = vmatpush1.bf16.msra.mxu1 %v3388_v19 }
 0x3c8   : > { %1535 = vmatprep.subr.bf16.mxu1 %v3695_v57 }
 0x3cb   : > { %1536 = vmatpush1.bf16.msra.mxu1 %v3389_v29 }
 0x3cc   : > { %1537 = vmatprep.subr.bf16.mxu1 %v3695_v57 }
 0x3cf   : > { %1538 = vmatpush1.bf16.msra.mxu1 %v3390_v22 }
 0x3d0   : > { %1539 = vmatprep.subr.bf16.mxu1 %v3695_v57 }
 0x3d3   : > { %1540 = vmatpush1.bf16.msra.mxu1 %v3391_v24 }
 0x3d4   : > { %1541 = vmatprep.subr.bf16.mxu1 %v3695_v57 }
 0x3d7   : > { %1542 = vmatpush1.bf16.msra.mxu1 %v3392_v26 }
 0x3d8   : > { %1543 = vmatprep.subr.bf16.mxu1 %v3695_v57 }
 0x3db   : > { %1544 = vmatpush1.bf16.msra.mxu1 %v3393_v25 }
 0x3dc   : > { %1545 = vmatprep.subr.bf16.mxu1 %v3695_v57 }
 0x3df   : > { %1546 = vmatpush1.bf16.msra.mxu1 %v3394_v30 }
 0x3e0   : > { %1547 = vmatprep.subr.bf16.mxu1 %v3695_v57 }
 0x3e3   : > { %1548 = vmatpush1.bf16.msra.mxu1 %v3395_v36  ;;  %v3400_v36 = vld [vmem:[#allocation11 + $0x98] sm:$0xff]  }
 0x3e4   : > { %1557 = vmatprep.subr.bf16.mxu1 %v3695_v57 }
 0x3e7   : > { %1558 = vmatpush2.bf16.msra.mxu1 %v3396_v37 }
 0x3e8   : > { %1559 = vmatprep.subr.bf16.mxu1 %v3695_v57 }
 0x3eb   : > { %1560 = vmatpush2.bf16.msra.mxu1 %v3397_v39  ;;  %v3401_v39 = vld [vmem:[#allocation11 + $0x90] sm:$0xff]  }
 0x3ec   : > { %1561 = vmatprep.subr.bf16.mxu1 %v3695_v57 }
 0x3ef   : > { %1562 = vmatpush2.bf16.msra.mxu1 %v3398_v41  ;;  %v3402_v41 = vld [vmem:[#allocation11 + $0x88] sm:$0xff]  }
 0x3f0   : > { %1563 = vmatprep.subr.bf16.mxu1 %v3695_v57 }
 0x3f3   : > { %1564 = vmatpush2.bf16.msra.mxu1 %v3399_v42  ;;  %v3403_v42 = vld [vmem:[#allocation11 + $0x80] sm:$0xff]  }
 0x3f4   : > { %1756 = vmatprep.subr.bf16.mxu1 %v3695_v57 }
 0x42d   : > { %v4256_v43 = vpop.f32.mrf.mxu0 }
 0x42f   : > { %v2293_v44 = vpop.f32.mrf.mxu0 }
 0x430   : > { %v3404_v44 = vld [vmem:[#allocation11 + $0x78] sm:$0xff]  }
 0x431   : > { %v2294_v45 = vpop.f32.mrf.mxu0 }
 0x432   : > { %v3405_v45 = vld [vmem:[#allocation11 + $0x70] sm:$0xff]  }
 0x433   : > { %v2295_v46 = vpop.f32.mrf.mxu0 }
 0x434   : > { %v3406_v46 = vld [vmem:[#allocation11 + $0x68] sm:$0xff]  }
 0x486   : > { %v1423_v54 = vpop.f32.mrf.mxu1 }
 0x487   : > { %v1430_v58 = vmul.f32 %v1423_v54, %v4261_v50  ;;  %v3410_v54 = vld [vmem:[#allocation11 + $0xa8] sm:$0xff]  }
 0x488   : > { %v1425_v7 = vpop.f32.mrf.mxu1 }
 0x489   : > { %v1431_v8 = vmul.f32 %v1425_v7, %v4264_v56  ;;  %v1456_v12 = vpack.c.bf16 %v1430_v58, %v1430_v58  ;;  %v3411_v58 = vld [vmem:[#allocation11 + $0xa0] sm:$0xff]  }
 0x48a   : > { %v1427_v9 = vpop.f32.mrf.mxu1 }
 0x48b   : > { %v1457_v11 = vpack.c.bf16 %v1431_v8, %v1431_v8 }
 0x48c   : > { %v1428_v28 = vpop.f32.mrf.mxu1 }
 0x48d   : > { %2971 = vmatprep.mubr.msk.bf16.mxu1 %vm1211_vm1, %v1457_v11 }
 0x48e   : > { %1566 = vmatmul.mubr.bf16.vlgmr.msra.gmra.mxu1 %v1456_v12 }
 0x48f   : > { %1757 = vmatpush1.bf16.msra.mxu1 %v3988_v55  ;;  %2992 = vmatprep.mubr.msk.bf16.mxu1 %vm1211_vm1, %v1752_v17  ;;  %v1751_v55 = vpack.c.bf16 %v4164_v51, %v4164_v51 }
 0x490   : > { %1758 = vmatprep.subr.bf16.mxu1 %v3695_v57 }
 0x493   : > { %1759 = vmatpush1.bf16.msra.mxu1 %v4001_v60 }
 0x494   : > { %1760 = vmatprep.subr.bf16.mxu1 %v3695_v57 }
 0x497   : > { %1761 = vmatpush1.bf16.msra.mxu1 %v4010_v61 }
 0x498   : > { %1762 = vmatprep.subr.bf16.mxu1 %v3695_v57 }
 0x49b   : > { %1763 = vmatpush1.bf16.msra.mxu1 %v4016_v62 }
 0x49c   : > { %1764 = vmatprep.subr.bf16.mxu1 %v3695_v57 }
 0x49f   : > { %1765 = vmatpush1.bf16.msra.mxu1 %v4025_v63 }
 0x4a0   : > { %1766 = vmatprep.subr.bf16.mxu1 %v3695_v57 }
 0x4a3   : > { %1767 = vmatpush1.bf16.msra.mxu1 %v4034_v0 }
 0x4a4   : > { %1768 = vmatprep.subr.bf16.mxu1 %v3695_v57 }
 0x4a7   : > { %1769 = vmatpush1.bf16.msra.mxu1 %v4043_v1 }
 0x4a8   : > { %1770 = vmatprep.subr.bf16.mxu1 %v3695_v57 }
 0x4ab   : > { %1771 = vmatpush1.bf16.msra.mxu1 %v4052_v2 }
 0x4ac   : > { %1780 = vmatprep.subr.bf16.mxu1 %v3695_v57 }
 0x4af   : > { %1781 = vmatpush2.bf16.msra.mxu1 %v4061_v3 }
 0x4b0   : > { %1782 = vmatprep.subr.bf16.mxu1 %v3695_v57 }
 0x4b3   : > { %1783 = vmatpush2.bf16.msra.mxu1 %v4070_v4 }
 0x4b4   : > { %1784 = vmatprep.subr.bf16.mxu1 %v3695_v57 }
 0x4b7   : > { %1785 = vmatpush2.bf16.msra.mxu1 %v4082_v5 }
 0x4b8   : > { %1786 = vmatprep.subr.bf16.mxu1 %v3695_v57 }
 0x4bb   : > { %1787 = vmatpush2.bf16.msra.mxu1 %v4091_v6 }
 0x4bc   : > { %3089 = vmatprep.subr.bf16.mxu1 %v3696_v31 }
 0x4be   : > { %1789 = vmatmul.mubr.bf16.vlgmr.msra.gmra.mxu1 %v1751_v55 }
 0x4bf   : > { %3090 = vmatpush3.bf16.msra.mxu1 %v4153_v33  ;;  %3093 = vmatprep.mubr.msk.bf16.mxu1 %vm3697_vm4, %v3696_v31 }
 0x4c0   : > { %3091 = vmatprep.subr.bf16.mxu1 %v3696_v31 }
 0x4c3   : > { %3092 = vmatpush3.bf16.msra.mxu1 %v4156_v34 }
 0x4c4   : > { %2995 = vmatprep.subr.msk.bf16.mxu1 %vm1318_vm3, %v4205_v35 }
 0x54e   : > { %v4305_v15 = vpop.f32.mrf.mxu1 }
 0x550   : > { %v1569_v16 = vpop.f32.mrf.mxu1 }
 0x551   : > { %v3448_v16 = vld [vmem:[%s4477_s7 + $0x38] sm:$0xff]  }
 0x552   : > { %v1570_v21 = vpop.f32.mrf.mxu1 }
 0x553   : > { %v3412_v21 = vld [vmem:[#allocation11 + $0xf8] sm:$0xff]  }
 0x554   : > { %v1571_v51 = vpop.f32.mrf.mxu1 }
 0x555   : > { %v3413_v51 = vld [vmem:[#allocation11 + $0xf0] sm:$0xff]  }
 0x57e   : > { %v1790_v53 = vpop.f32.mrf.mxu1 }
 0x57f   : > { %v1834_v32 = vadd.f32 %v4200_v27, %v1790_v53  ;;  %v3415_v53 = vld [vmem:[#allocation11 + $0xe0] sm:$0xff]  }
 0x580   : > { %v1792_v13 = vpop.f32.mrf.mxu1 }
 0x581   : > { %v1839_v33 = vsel %vm1298_vm2, %v1834_v32, -inf  ;;  %v3417_v13 = vld [vmem:[#allocation11 + $0xd0] sm:$0xff]  }
 0x582   : > { %1840 = vmax.xlane.f32.xlu0 %v1839_v33  ;;  %v1793_v10 = vpop.f32.mrf.mxu1  ;;  %v3418_v33 = vld [vmem:[#allocation11 + $0xc8] sm:$0xff]  }
 0x583   : > { %v3419_v10 = vld [vmem:[#allocation11 + $0xc0] sm:$0xff]  }
 0x584   : > { %v1794_v14 = vpop.f32.mrf.mxu1 }
 0x585   : > { %v3420_v14 = vld [vmem:[#allocation11 + $0x118] sm:$0xff]  }
 0x60b   : > { %v1841_v18 = vpop.xlane.xlu0 %1840 }
 0x60c   : > { %v1842_v19 = vsub.f32 %v1834_v32, %v1841_v18  ;;  %v3416_v32 = vld [vmem:[#allocation11 + $0xd8] sm:$0xff]   ;;  %v3421_v18 = vld [vmem:[#allocation11 + $0x110] sm:$0xff]  }
 0x60e   : > { %v1843_v34 = vmul.f32 1.442695, %v1842_v19 }
 0x610   : > { %3436 = vpow2.f32 %v1843_v34 }
 0x61d   : > { %v3437_v20 = vpop.eup %3436 }
 0x61e   : > { %v1845_v29 = vpack.c.bf16 %v3437_v20, %v3437_v20 }
 0x620   : > { %3094 = vmatmul.mubr.msk.bf16.vlgmr.msra.gmra.mxu1 %vm1298_vm2, %v1845_v29 }
 0x621   : > { %1908 = vmatpush1.bf16.msra.mxu1 %v4215_v38  ;;  %1927 = vmatprep.mubr.bf16.mxu1 %v3695_v57 }
 0x622   : > { %1909 = vmatprep.subr.bf16.mxu1 %v4210_v23 }
 0x625   : > { %1910 = vmatpush1.bf16.msra.mxu1 %v4221_v40 }
 0x626   : > { %2040 = vmatprep.subr.bf16.mxu1 %v3695_v57 }
 0x6e0   : > { %v1883_v27 = vpop.f32.mrf.mxu1 }
 0x6e1   : > { %3438 = vrcp.f32 %v1883_v27 }
 0x6e2   : > { %v3095_v22 = vpop.f32.mrf.mxu1 }
 0x6e4   : > { %v1886_v24 = vpop.f32.mrf.mxu1 }
 0x6e6   : > { %v3096_v26 = vpop.f32.mrf.mxu1 }
 0x6e7   : > { %v3422_v26 = vld [vmem:[#allocation11 + $0x108] sm:$0xff]  }
 0x6ee   : > { %v3439_v25 = vpop.eup %3438 }
 0x6ef   : > { %v1890_v30 = vmul.f32 %v3439_v25, %v3437_v20  ;;  %v3423_v25 = vld [vmem:[#allocation11 + $0x100] sm:$0xff]  }
 0x6f1   : > { %v1891_v37 = vpack.c.bf16 %v1890_v30, %v1890_v30  ;;  %v3424_v30 = vld [vmem:[%s4482_s12 + $0x38] sm:$0xff]  }
 0x6f3   : > { %2996 = vmatmul.mubr.msk.bf16.vlgmr.msra.gmra.mxu1 %vm1298_vm2, %v1891_v37  ;;  %v3426_v37 = vld [vmem:[%s4482_s12 + $0x28] sm:$0xff]  }
 0x6f4   : > { %2041 = vmatpush1.bf16.msra.mxu1 %v3400_v36  ;;  %v3425_v36 = vld [vmem:[%s4482_s12 + $0x30] sm:$0xff]  }
 0x6f5   : > { %2042 = vmatprep.subr.bf16.mxu1 %v3695_v57 }
 0x6f8   : > { %2043 = vmatpush1.bf16.msra.mxu1 %v3401_v39  ;;  %v3428_v39 = vld [vmem:[%s4482_s12 + $0x18] sm:$0xff]  }
 0x6f9   : > { %2044 = vmatprep.subr.bf16.mxu1 %v3695_v57 }
 0x6fc   : > { %2045 = vmatpush1.bf16.msra.mxu1 %v3402_v41  ;;  %v3429_v41 = vld [vmem:[%s4482_s12 + $0x10] sm:$0xff]  }
 0x6fd   : > { %2046 = vmatprep.subr.bf16.mxu1 %v3695_v57 }
 0x700   : > { %2047 = vmatpush1.bf16.msra.mxu1 %v3403_v42 }
 0x701   : > { %2048 = vmatprep.subr.bf16.mxu1 %v3695_v57 }
 0x704   : > { %2049 = vmatpush1.bf16.msra.mxu1 %v3404_v44 }
 0x705   : > { %2050 = vmatprep.subr.bf16.mxu1 %v3695_v57 }
 0x708   : > { %2051 = vmatpush1.bf16.msra.mxu1 %v3405_v45 }
 0x709   : > { %2052 = vmatprep.subr.bf16.mxu1 %v3695_v57 }
 0x70c   : > { %2053 = vmatpush1.bf16.msra.mxu1 %v3406_v46 }
 0x70d   : > { %2054 = vmatprep.subr.bf16.mxu1 %v3695_v57 }
 0x710   : > { %2055 = vmatpush1.bf16.msra.mxu1 %v3407_v47 }
 0x711   : > { %2064 = vmatprep.subr.bf16.mxu1 %v3695_v57 }
 0x714   : > { %2065 = vmatpush2.bf16.msra.mxu1 %v3408_v48 }
 0x715   : > { %2066 = vmatprep.subr.bf16.mxu1 %v3695_v57 }
 0x718   : > { %2067 = vmatpush2.bf16.msra.mxu1 %v3409_v49 }
 0x719   : > { %2068 = vmatprep.subr.bf16.mxu1 %v3695_v57 }
 0x71c   : > { %2069 = vmatpush2.bf16.msra.mxu1 %v3410_v54 }
 0x71d   : > { %2070 = vmatprep.subr.bf16.mxu1 %v3695_v57 }
 0x720   : > { %2071 = vmatpush2.bf16.msra.mxu1 %v3411_v58  ;;  %v3430_v58 = vld [vmem:[%s4482_s12 + $0x8] sm:$0xff]  }
 0x721   : > { %2300 = vmatprep.subr.bf16.mxu1 %v3695_v57 }
 0x7b3   : > { %v1929_v7 = vpop.f32.mrf.mxu1 }
 0x7b4   : > { %v1936_v8 = vmul.f32 %v1929_v7, %v4261_v50 }
 0x7b5   : > { %v1931_v9 = vpop.f32.mrf.mxu1 }
 0x7b6   : > { %v1937_v11 = vmul.f32 %v1931_v9, %v4264_v56  ;;  %v1963_v17 = vpack.c.bf16 %v1936_v8, %v1936_v8 }
 0x7b7   : > { %v1933_v12 = vpop.f32.mrf.mxu1 }
 0x7b8   : > { %v1964_v28 = vpack.c.bf16 %v1937_v11, %v1937_v11 }
 0x7b9   : > { %v1934_v55 = vpop.f32.mrf.mxu1 }
 0x7ba   : > { %3009 = vmatprep.mubr.msk.bf16.mxu1 %vm1211_vm1, %v1964_v28 }
 0x7bb   : > { %2073 = vmatmul.mubr.bf16.vlgmr.msra.gmra.mxu1 %v1963_v17  ;;  %v3047_v17 = vld [vmem:[%s4483_s13] ss:$0 sm:$0xff] }
 0x7bc   : > { %2301 = vmatpush1.bf16.msra.mxu1 %v3448_v16  ;;  %3030 = vmatprep.mubr.msk.bf16.mxu1 %vm1211_vm1, %v4233_v59 }
 0x7bd   : > { %2302 = vmatprep.subr.bf16.mxu1 %v3695_v57 }
 0x7c0   : > { %2303 = vmatpush1.bf16.msra.mxu1 %v4001_v60  ;;  %v2972_v60 = vld [vmem:[%s4481_s11] ss:$0 sm:$0xff] }
 0x7c1   : > { %2304 = vmatprep.subr.bf16.mxu1 %v3695_v57 }
 0x7c4   : > { %2305 = vmatpush1.bf16.msra.mxu1 %v4010_v61  ;;  %v1579_v61 = vadd.f32 %v2972_v60, %v4305_v15 }
 0x7c5   : > { %2306 = vmatprep.subr.bf16.mxu1 %v3695_v57 }
 0x7c8   : > { %2307 = vmatpush1.bf16.msra.mxu1 %v4016_v62 }
 0x7c9   : > { %2308 = vmatprep.subr.bf16.mxu1 %v3695_v57 }
 0x7cc   : > { %2309 = vmatpush1.bf16.msra.mxu1 %v4025_v63 }
 0x7cd   : > { %2310 = vmatprep.subr.bf16.mxu1 %v3695_v57 }
 0x7d0   : > { %2311 = vmatpush1.bf16.msra.mxu1 %v4034_v0 }
 0x7d1   : > { %2312 = vmatprep.subr.bf16.mxu1 %v3695_v57 }
 0x7d4   : > { %2313 = vmatpush1.bf16.msra.mxu1 %v4043_v1 }
 0x7d5   : > { %2314 = vmatprep.subr.bf16.mxu1 %v3695_v57 }
 0x7d8   : > { %2315 = vmatpush1.bf16.msra.mxu1 %v4052_v2 }
 0x7d9   : > { %2324 = vmatprep.subr.bf16.mxu1 %v3695_v57 }
 0x7dc   : > { %2325 = vmatpush2.bf16.msra.mxu1 %v4061_v3 }
 0x7dd   : > { %2326 = vmatprep.subr.bf16.mxu1 %v3695_v57 }
 0x7e0   : > { %2327 = vmatpush2.bf16.msra.mxu1 %v4070_v4 }
 0x7e1   : > { %2328 = vmatprep.subr.bf16.mxu1 %v3695_v57 }
 0x7e4   : > { %2329 = vmatpush2.bf16.msra.mxu1 %v4082_v5 }
 0x7e5   : > { %2330 = vmatprep.subr.bf16.mxu1 %v3695_v57 }
 0x7e8   : > { %2331 = vmatpush2.bf16.msra.mxu1 %v4091_v6 }
 0x7e9   : > { %3032 = vmatprep.subr.msk.bf16.mxu1 %vm1318_vm3, %v4205_v35 }
 0x7eb   : > { %2333 = vmatmul.mubr.bf16.vlgmr.msra.gmra.mxu1 %v4229_v52 }
 0x7ec   : > { %2409 = vmatpush1.bf16.msra.mxu1 %v4215_v38  ;;  %2428 = vmatprep.mubr.bf16.mxu1 %v3695_v57 }
 0x7ed   : > { %2410 = vmatprep.subr.bf16.mxu1 %v4210_v23 }
 0x7f0   : > { %2411 = vmatpush1.bf16.msra.mxu1 %v4221_v40 }
 0x7f1   : > { %3105 = vmatprep.subr.bf16.mxu1 %v3696_v31 }
 0x87b   : > { %v2074_v62 = vpop.f32.mrf.mxu1 }
 0x87c   : > { %v4370_v63 = vadd.f32 %v2074_v62, %v1579_v61 }
 0x87d   : > { %v2076_v0 = vpop.f32.mrf.mxu1 }
 0x87f   : > { %v2077_v1 = vpop.f32.mrf.mxu1 }
 0x881   : > { %v2078_v2 = vpop.f32.mrf.mxu1 }
 0x8ab   : > { %v2334_v3 = vpop.f32.mrf.mxu1 }
 0x8ac   : > { %v2335_v4 = vadd.f32 %v2334_v3, %v4256_v43  ;;  %v3414_v43 = vld [vmem:[#allocation11 + $0xe8] sm:$0xff]  }
 0x8ad   : > { %v2336_v5 = vpop.f32.mrf.mxu1 }
 0x8ae   : > { %v2340_v6 = vsel %vm1298_vm2, %v2335_v4, -inf }
 0x8af   : > { %v2337_v35 = vpop.f32.mrf.mxu1  ;;  %2341 = vmax.xlane.f32.xlu1 %v2340_v6 }
 0x8b1   : > { %v2338_v23 = vpop.f32.mrf.mxu1 }
 0x938   : > { %v2342_v38 = vpop.xlane.xlu1 %2341 }
 0x939   : > { %v2343_v40 = vsub.f32 %v2335_v4, %v2342_v38  ;;  %v3056_v38 = vld [vmem:[%s4484_s14] ss:$0 sm:$0xff] }
 0x93b   : > { %v2344_v52 = vmul.f32 1.442695, %v2343_v40 }
 0x93d   : > { %3440 = vpow2.f32 %v2344_v52  ;;  %v3057_v52 = vld [vmem:[%s4485_s15] ss:$0 sm:$0xff] }
 0x94a   : > { %v3441_v59 = vpop.eup %3440 }
 0x94b   : > { %v2346_v15 = vpack.c.bf16 %v3441_v59, %v3441_v59 }
 0x94d   : > { %3102 = vmatmul.mubr.msk.bf16.vlgmr.msra.gmra.mxu0 %vm1298_vm2, %v2346_v15 }
 0x94e   : > { %2542 = vmatpush1.bf16.msra.mxu0 %v3412_v21 }
 0x94f   : > { %2543 = vmatprep.subr.bf16.mxu0 %v3695_v57 }
 0x952   : > { %2544 = vmatpush1.bf16.msra.mxu0 %v3413_v51 }
 0x953   : > { %2545 = vmatprep.subr.bf16.mxu0 %v3695_v57 }
 0x956   : > { %2546 = vmatpush1.bf16.msra.mxu0 %v3414_v43 }
 0x957   : > { %2547 = vmatprep.subr.bf16.mxu0 %v3695_v57 }
 0x95a   : > { %2548 = vmatpush1.bf16.msra.mxu0 %v3415_v53 }
 0x95b   : > { %2549 = vmatprep.subr.bf16.mxu0 %v3695_v57 }
 0x95e   : > { %2550 = vmatpush1.bf16.msra.mxu0 %v3416_v32 }
 0x95f   : > { %2551 = vmatprep.subr.bf16.mxu0 %v3695_v57 }
 0x962   : > { %2552 = vmatpush1.bf16.msra.mxu0 %v3417_v13 }
 0x963   : > { %2553 = vmatprep.subr.bf16.mxu0 %v3695_v57 }
 0x966   : > { %2554 = vmatpush1.bf16.msra.mxu0 %v3418_v33 }
 0x967   : > { %2555 = vmatprep.subr.bf16.mxu0 %v3695_v57 }
 0x96a   : > { %2556 = vmatpush1.bf16.msra.mxu0 %v3419_v10 }
 0x96b   : > { %2565 = vmatprep.subr.bf16.mxu0 %v3695_v57 }
 0x96e   : > { %2566 = vmatpush2.bf16.msra.mxu0 %v3420_v14 }
 0x96f   : > { %2567 = vmatprep.subr.bf16.mxu0 %v3695_v57 }
 0x972   : > { %2568 = vmatpush2.bf16.msra.mxu0 %v3421_v18 }
 0x973   : > { %2569 = vmatprep.subr.bf16.mxu0 %v3695_v57 }
 0x976   : > { %2570 = vmatpush2.bf16.msra.mxu0 %v3422_v26 }
 0x977   : > { %2571 = vmatprep.subr.bf16.mxu0 %v3695_v57  ;;  %v3427_v57 = vld [vmem:[%s4482_s12 + $0x20] sm:$0xff]  }
 0x97a   : > { %2572 = vmatpush2.bf16.msra.mxu0 %v3423_v25 }
 0xa0d   : > { %v2384_v19 = vpop.f32.mrf.mxu0 }
 0xa0e   : > { %3442 = vrcp.f32 %v2384_v19 }
 0xa0f   : > { %v3103_v34 = vpop.f32.mrf.mxu0 }
 0xa11   : > { %v2387_v20 = vpop.f32.mrf.mxu0 }
 0xa13   : > { %v3104_v29 = vpop.f32.mrf.mxu0 }
 0xa1b   : > { %v3443_v27 = vpop.eup %3442 }
 0xa1c   : > { %v2391_v22 = vmul.f32 %v3443_v27, %v3441_v59 }
 0xa1e   : > { %v2392_v24 = vpack.c.bf16 %v2391_v22, %v2391_v22 }
 0xa20   : > { %3033 = vmatmul.mubr.msk.bf16.vlgmr.msra.gmra.mxu1 %vm1298_vm2, %v2392_v24 }
 0xa21   : > { %3121 = vmatprep.mubr.msk.bf16.mxu1 %vm3697_vm4, %v3696_v31  ;;  %3106 = vmatpush3.bf16.msra.mxu1 %v3424_v30 }
 0xa22   : > { %3107 = vmatprep.subr.bf16.mxu1 %v3696_v31 }
 0xa25   : > { %3108 = vmatpush3.bf16.msra.mxu1 %v3425_v36 }
 0xa26   : > { %3109 = vmatprep.subr.bf16.mxu1 %v3696_v31 }
 0xa29   : > { %3110 = vmatpush3.bf16.msra.mxu1 %v3426_v37 }
 0xa2a   : > { %3111 = vmatprep.subr.bf16.mxu1 %v3696_v31 }
 0xa2d   : > { %3112 = vmatpush3.bf16.msra.mxu1 %v3427_v57 }
 0xa2e   : > { %3113 = vmatprep.subr.bf16.mxu1 %v3696_v31 }
 0xa31   : > { %3114 = vmatpush3.bf16.msra.mxu1 %v3428_v39 }
 0xa32   : > { %3115 = vmatprep.subr.bf16.mxu1 %v3696_v31 }
 0xa35   : > { %3116 = vmatpush3.bf16.msra.mxu1 %v3429_v41 }
 0xa36   : > { %3117 = vmatprep.subr.bf16.mxu1 %v3696_v31 }
 0xa39   : > { %3118 = vmatpush3.bf16.msra.mxu1 %v3430_v58 }
 0xa3a   : > { %3119 = vmatprep.subr.bf16.mxu1 %v3696_v31 }
 0xae0   : > { %v2430_v42 = vpop.f32.mrf.mxu1 }
 0xae1   : > { %v2437_v44 = vmul.f32 %v2430_v42, %v4261_v50  ;;  %v3431_v50 = vld [vmem:[%s4482_s12] sm:$0xff]  }
 0xae2   : > { %v2432_v45 = vpop.f32.mrf.mxu1  ;;  %3120 = vmatpush3.bf16.msra.mxu1 %v3431_v50 }
 0xae3   : > { %v2438_v46 = vmul.f32 %v2432_v45, %v4264_v56  ;;  %v2464_v49 = vpack.c.bf16 %v2437_v44, %v2437_v44 }
 0xae4   : > { %v2434_v47 = vpop.f32.mrf.mxu1 }
 0xae5   : > { %v2465_v48 = vpack.c.bf16 %v2438_v46, %v2438_v46 }
 0xae6   : > { %v2435_v54 = vpop.f32.mrf.mxu1 }
 0xae7   : > { %3046 = vmatprep.mubr.msk.bf16.mxu0 %vm1211_vm1, %v2465_v48 }
 0xae8   : > { %2574 = vmatmul.mubr.bf16.vlgmr.msra.gmra.mxu0 %v2464_v49 }
 0xba8   : > { %v2575_v56 = vpop.f32.mrf.mxu0 }
 0xba9   : > { %v2581_v7 = vadd.f32 %v2575_v56, %v4370_v63 }
 0xbaa   : > { %v2577_v8 = vpop.f32.mrf.mxu0 }
 0xbab   : > { %v2582_v9 = vmax.f32 %v2581_v7, 0.0 }
 0xbac   : > { %v2578_v11 = vpop.f32.mrf.mxu0 }
 0xbad   : > { %v2599_v12 = vpack.c.bf16 %v2582_v9, %v2582_v9 }
 0xbae   : > { %v2579_v28 = vpop.f32.mrf.mxu0 }
 0xbaf   : > { %3122 = vmatmul.mubr.bf16.vlgmr.msra.gmra.mxu1 %v2599_v12 }
 0xc6f   : > { %v2689_v55 = vpop.f32.mrf.mxu1 }
 0xc70   : > { %v2690_v31 = vadd.f32 %v3047_v17, %v2689_v55 }
 0xc71   : > { %v3123_v16 = vpop.f32.mrf.mxu1 }
 0xc72   : > { %3444 = vtanh.f32 %v2690_v31 }
 0xc73   : > { %v2692_v60 = vpop.f32.mrf.mxu1 }
 0xc75   : > { %v3124_v61 = vpop.f32.mrf.mxu1 }
 0xc7f   : > { %v3445_v62 = vpop.eup %3444 }
 0xc80   : > { %v2696_v63 = vsel %vm1211_vm1, %v3445_v62, 0.0 }
 0xc81   : > { %2697 = vadd.xlane.f32.xlu1 %v2696_v63 }
 0xd0a   : > { %v2698_v0 = vpop.xlane.xlu1 %2697 }
 0xd0b   : > { %v2700_v1 = vmul.f32 0.015625, %v2698_v0 }
 0xd0d   : > { %v2701_v2 = vsub.f32 %v3445_v62, %v2700_v1 }
 0xd0f   : > { %v2702_v3 = vmul.f32 %v2701_v2, %v2701_v2 }
 0xd11   : > { %v2703_v4 = vsel %vm1211_vm1, %v2702_v3, 0.0 }
 0xd12   : > { %2704 = vadd.xlane.f32.xlu0 %v2703_v4 }
 0xd9b   : > { %v2705_v5 = vpop.xlane.xlu0 %2704 }
 0xd9c   : > { %v2706_v6 = vmul.f32 0.015625, %v2705_v5 }
 0xd9e   : > { %v2707_v35 = vadd.f32 1e-05, %v2706_v6 }
 0xda0   : > { %3446 = vrsqrt.f32 %v2707_v35 }
 0xdad   : > { %v3447_v23 = vpop.eup %3446 }
 0xdae   : > { %v2709_v40 = vmul.f32 %v3447_v23, %v2701_v2 }
 0xdb0   : > { %v2717_v59 = vmul.f32 %v3056_v38, %v2709_v40 }
 0xdb2   : > { %v2725_v15 = vadd.f32 %v3057_v52, %v2717_v59 }
 0xdb4   : > { %2726 = vst.msk [vmem:[%s600_s24] sm:$0xff] %vm1211_vm1, %v2725_v15 }
 0xdb5   : > { %3618 = shalt.err (!%p3615_p6)
}
 0xdb6   : > { %s3619_s27 = scalar_lea.hbm %s2739_s20, 128  ;;  %s3623_s23 = scalar_lea.hbm %s4522_s26, 256 }
 0xdb7   : > { %p3620_p10 = scmp.ne.s32.totalorder %s2739_s20, %s3619_s27  ;;  %p3624_p11 = scmp.lt.s32.totalorder %s2739_s20, %s4522_s26 }
 0xdb8   : > { %p3625_p0 = scmp.lt.s32.totalorder %s3623_s23, %s3619_s27 }
 0xdb9   : > { %p3621_p8 = pnand %p3620_p10, %p4523_p3 }
 0xdba   : > { %p3626_p1 = por %p3625_p0, %p3624_p11 }
 0xdbb   : > { %p3622_p12 = pneg %p3621_p8 }
 0xdbd   : > { %p3627_p2 = pnand %p3626_p1, %p3622_p12 }
 0xdbf   : > { %3630 = shalt.err (!%p3627_p2)
}
 0xdc0   : > { %3149 = dma.vmem_to_hbm [thread:$0]  (%p4523_p3), %s2742_s19, 128, %s2739_s20, %s2728_s21  }
 0xdc1 PF: > { %s4524_s17 = sld [smem:[#allocation21_spill]] }
 0xdc2   : > { %s4525_s30 = sld [smem:[#allocation19_spill]] }
 0xdc3   : > { %s4526_s18 = sld [smem:[#allocation24_spill]] }
 0xdc7   : > { %p3186_p9 = scmp.ge.s32.totalorder %s4524_s17, 2 }
 0xdc8   : > { %s2753_s29 = sand.u32 1, %s4525_s30  }
 0xdc9   : > { %p4527_p4 = scmp.ne.s32.totalorder %s4526_s18, 0  ;;  %s2754_s25 = scalar_lea.sflag [#allocation4], %s2753_s29 }
 0xdcb   : > { %p3171_p7 = pnand %p3186_p9, %p4527_p4 }
 0xdcd   : > { %p3172_p5 = pneg %p3171_p7 }
 0xdcf   : > { %3664 = dma.done.wait (%p3172_p5), %s2754_s25, 128  }
 0xdd0   : > { %3666 = vsyncadd (%p3172_p5), %s2754_s25, 4294967168  ;;  %s4528_s24 = sld [smem:[#allocation22_spill]]  ;;  %s4531_s21 = smov %s3673_s22 }
 0xdd1   : > { %s4529_s27 = sld [smem:[#allocation20_spill]] }
 0xdd2   : > { %s4530_s23 = sld [smem:[#allocation23_spill]] }
 0xdd6   : > { %p30_p13 = scmp.ge.s32.totalorder %s4528_s24, 4  }
 0xdd7   : > { %s4532_s22 = smov %s4529_s27 }
 0xdd8   :  { %32 = sbr.rel (!%p30_p13) target bundleno = 11 (0xb), region = 150 }
 0xddd   :  { %2759 = vsyncpa [#allocation3], 1 }
 0xdde   :  { %2761 = vsyncpa [#allocation3 + $0x1], 1 }
 0xddf   :  { %2762 = vsyncpa [#allocation6], 1 }
 0xde0   :  { %2763 = vsyncpa [#allocation9], 1 }
 0xde1   :  { %2764 = vsyncpa [#allocation12], 1 }
 0xde2   :  { %2765 = vsyncpa [#allocation4], 1 }
 0xde3   :  { %2767 = vsyncpa [#allocation4 + $0x1], 1 }

</bundles_post_ra>
